<compile_context>
chip_gen: v7x
topology: tpu7x:2x2x1
jax: 0.10.0
libtpu: 0.0.40
codegen_flags: <defaults>
</compile_context>

<pallas_src>
import functools
import math

import jax
import jax.numpy as jnp
from jax import lax
from jax.experimental import pallas as pl
from jax.experimental.pallas import tpu as pltpu


# ---------------------------------------------------------------------------
# in-kernel helpers (all f32 vector math)
# ---------------------------------------------------------------------------
def _layer_norm(x, w, b, eps=1e-5):
    # PyTorch nn.LayerNorm: biased variance over the last dim, eps=1e-5.
    mu = jnp.mean(x, axis=-1, keepdims=True)
    xc = x - mu
    var = jnp.mean(xc * xc, axis=-1, keepdims=True)
    return xc * lax.rsqrt(var + eps) * w + b


def _gelu_exact(x):
    # PyTorch nn.GELU() default = exact erf-based GELU.
    return 0.5 * x * (1.0 + lax.erf(x * (1.0 / math.sqrt(2.0))))


# ---------------------------------------------------------------------------
# fused whole-encoder kernel: grid = (batch_tiles, num_layers)
# ---------------------------------------------------------------------------
def _encoder_kernel(num_heads,
                    x_ref, pos_ref,
                    ln1_w, ln1_b, wqkv, bqkv, wo, bo,
                    ln2_w, ln2_b, w1, b1, w2, b2,
                    lnf_w, lnf_b,
                    o_ref,
                    resid_ref, attn_ref):
    l = pl.program_id(1)
    last_l = pl.num_programs(1) - 1

    bt, n, d = x_ref.shape
    m = bt * n
    hd = d // num_heads
    inv_scale = 1.0 / math.sqrt(hd)

    # Layer 0: seed the VMEM residual stream with x + positional embedding.
    @pl.when(l == 0)
    def _():
        resid_ref[...] = (x_ref[...] + pos_ref[...]).reshape(m, d)

    x = resid_ref[...]                                   # (M, D) f32 residual

    # ---- self-attention branch (pre-LN) ----
    xn = _layer_norm(x, ln1_w[...], ln1_b[...])
    xn_b = xn.astype(jnp.bfloat16)

    # fused QKV: one bf16 x bf16 -> f32 MXU matmul
    qkv = jnp.dot(xn_b, wqkv[...], preferred_element_type=jnp.float32) + bqkv[...]
    q = (qkv[:, :d] * inv_scale).astype(jnp.bfloat16)    # fold 1/sqrt(hd) once
    k = qkv[:, d:2 * d].astype(jnp.bfloat16)
    v = qkv[:, 2 * d:].astype(jnp.bfloat16)

    # per-head attention, batched over the batch tile (heads is small & static)
    for h in range(num_heads):
        sl = slice(h * hd, (h + 1) * hd)
        qh = q[:, sl].reshape(bt, n, hd)
        kh = k[:, sl].reshape(bt, n, hd)
        vh = v[:, sl].reshape(bt, n, hd)
        # contraction on the last dim -> no explicit K transpose / relayout
        s = jnp.einsum('bqd,bkd->bqk', qh, kh,
                       preferred_element_type=jnp.float32)
        s = s - jnp.max(s, axis=-1, keepdims=True)
        e = jnp.exp(s)
        # softmax reciprocal on the EUP slot (free next to VALU/MXU work)
        p = e * pl.reciprocal(jnp.sum(e, axis=-1, keepdims=True), approx=True)
        oh = jnp.einsum('bqk,bkd->bqd', p.astype(jnp.bfloat16), vh,
                        preferred_element_type=jnp.float32)
        # write into VMEM scratch slice (bounds live ranges, no lane concat)
        attn_ref[:, sl] = oh.reshape(m, hd)

    # single (M, D) @ (D, D) output projection (K = D on MXU)
    attn_out = jnp.dot(attn_ref[...].astype(jnp.bfloat16), wo[...],
                       preferred_element_type=jnp.float32) + bo[...]
    x1 = x + attn_out                                    # residual 1 (f32)

    # ---- MLP branch (pre-LN) ----
    xn2 = _layer_norm(x1, ln2_w[...], ln2_b[...])
    h1 = jnp.dot(xn2.astype(jnp.bfloat16), w1[...],
                 preferred_element_type=jnp.float32) + b1[...]
    h1 = _gelu_exact(h1)                                 # f32 GELU
    mlp = jnp.dot(h1.astype(jnp.bfloat16), w2[...],
                  preferred_element_type=jnp.float32) + b2[...]
    out = x1 + mlp                                       # residual 2

    resid_ref[...] = out                                 # carry to next layer

    # Last layer: final LayerNorm, write the batch tile back to HBM once.
    @pl.when(l == last_l)
    def _():
        y = _layer_norm(out, lnf_w[...], lnf_b[...])
        o_ref[...] = y.reshape(bt, n, d).astype(o_ref.dtype)


# ---------------------------------------------------------------------------
# wrapper: specs, batch-tile choice, VMEM budget
# ---------------------------------------------------------------------------
_STACKED_KEYS = ("ln1_w", "ln1_b", "wqkv", "bqkv", "wo", "bo",
                 "ln2_w", "ln2_b", "w1", "b1", "w2", "b2")


def _nbytes(a):
    return int(math.prod(a.shape)) * jnp.dtype(a.dtype).itemsize


def _vmem_capacity_bytes():
    try:
        cap = getattr(pltpu.get_tpu_info(), "vmem_capacity_bytes", None)
        if cap:
            return int(cap)
    except Exception:
        pass
    return 64 << 20        # conservative fallback (v7x per-TensorCore VMEM)


def _stacked_spec(per_layer_shape):
    # weights stacked with a leading layer dim; kernel sees per-layer shape
    zeros = (0,) * len(per_layer_shape)
    return pl.BlockSpec((None,) + tuple(int(s) for s in per_layer_shape),
                        lambda b, l, _z=zeros: (l,) + _z)


def _step_bytes(bt, n, d, mlp_dim, layer_w_bytes):
    m = bt * n
    return (2 * layer_w_bytes                         # double-buffered weights
            + 4 * 4 * bt * n * d                      # x-in + out blocks (x2 bufs)
            + 2 * 4 * m * d                           # resid + attn scratch
            + 2 * 4 * (m * (4 * d + mlp_dim) + bt * n * n))   # f32 intermediates


def _choose_batch_tile(B, n, d, mlp_dim, usable_vmem, layer_w_bytes):
    target_rows = 256      # fills the 256-deep v6e/v7x MXU; helps v5e too
    best = 1
    for cand in range(1, B + 1):
        if B % cand:
            continue
        if cand * n > max(target_rows, n):
            break
        if _step_bytes(cand, n, d, mlp_dim, layer_w_bytes) > int(usable_vmem * 0.75):
            break
        best = cand
    return best


def encoder_forward(x, params, num_heads):
    B, N, D = x.shape
    assert D % num_heads == 0
    L = int(params["wqkv"].shape[0])
    mlp_dim = int(params["w1"].shape[-1])

    cap = _vmem_capacity_bytes()
    usable = int(cap * 0.8)               # ~51 MiB on v7x, ~102 MiB on v5e/v6e

    layer_w_bytes = sum(_nbytes(params[k]) for k in _STACKED_KEYS) // L
    bt = _choose_batch_tile(B, N, D, mlp_dim, usable, layer_w_bytes)
    m = bt * N

    const_bytes = _nbytes(params["pos"]) + _nbytes(params["lnf_w"]) * 2
    need = _step_bytes(bt, N, D, mlp_dim, layer_w_bytes) + const_bytes
    vmem_limit = int(min(usable, max(need + (8 << 20), 32 << 20)))

    inputs = [x, params["pos"]]
    in_specs = [
        pl.BlockSpec((bt, N, D), lambda b, l: (b, 0, 0)),     # activations
        pl.BlockSpec((1, N, D), lambda b, l: (0, 0, 0)),      # pos embedding
    ]
    for key in _STACKED_KEYS:
        w = params[key]
        inputs.append(w)
        in_specs.append(_stacked_spec(w.shape[1:]))
    inputs += [params["lnf_w"], params["lnf_b"]]
    in_specs += [pl.BlockSpec((1, D), lambda b, l: (0, 0)),
                 pl.BlockSpec((1, D), lambda b, l: (0, 0))]

    kernel = functools.partial(_encoder_kernel, num_heads)

    return pl.pallas_call(
        kernel,
        out_shape=jax.ShapeDtypeStruct((B, N, D), x.dtype),
        grid=(B // bt, L),
        in_specs=in_specs,
        out_specs=pl.BlockSpec((bt, N, D), lambda b, l: (b, 0, 0)),
        scratch_shapes=[pltpu.VMEM((m, D), jnp.float32),      # residual stream
                        pltpu.VMEM((m, D), jnp.float32)],     # attn head outputs
        compiler_params=pltpu.CompilerParams(
            # batch axis parallel (v7x megacore), layer axis is a carried loop
            dimension_semantics=("parallel", "arbitrary"),
            vmem_limit_bytes=vmem_limit),
    )(*inputs)


# ---------------------------------------------------------------------------
# deterministic parameter init (stacked per-layer weights)
# ---------------------------------------------------------------------------
def init_params(key, num_patches, emb_dim, mlp_dim, num_heads, num_layers):
    del num_heads  # head split is a column slicing of the fused (D, 3D) weight
    n = num_patches + 1
    d = emb_dim
    scale = 0.02
    wdt = jnp.bfloat16     # weight matrices in bf16 (MXU-native, halves DMA/VMEM)
    keys = jax.random.split(key, 5)

    def rnd(k, shape):
        return (scale * jax.random.normal(k, shape, jnp.float32)).astype(wdt)

    return {
        "pos": jax.random.normal(keys[0], (1, n, d), jnp.float32),
        # LinearGeneral q/k/v flattened to (D, D) each and fused along columns
        "wqkv": rnd(keys[1], (num_layers, d, 3 * d)),
        "bqkv": jnp.zeros((num_layers, 1, 3 * d), jnp.float32),
        # LinearGeneral (H, Hd, D) flattened to (H*Hd, D)
        "wo": rnd(keys[2], (num_layers, d, d)),
        "bo": jnp.zeros((num_layers, 1, d), jnp.float32),
        "ln1_w": jnp.ones((num_layers, 1, d), jnp.float32),
        "ln1_b": jnp.zeros((num_layers, 1, d), jnp.float32),
        "ln2_w": jnp.ones((num_layers, 1, d), jnp.float32),
        "ln2_b": jnp.zeros((num_layers, 1, d), jnp.float32),
        # nn.Linear weights stored transposed: fc1 (D, mlp), fc2 (mlp, D)
        "w1": rnd(keys[3], (num_layers, d, mlp_dim)),
        "b1": jnp.zeros((num_layers, 1, mlp_dim), jnp.float32),
        "w2": rnd(keys[4], (num_layers, mlp_dim, d)),
        "b2": jnp.zeros((num_layers, 1, d), jnp.float32),
        "lnf_w": jnp.ones((1, d), jnp.float32),
        "lnf_b": jnp.zeros((1, d), jnp.float32),
    }


# ---------------------------------------------------------------------------
# pure-JAX reference (same bf16 weight/activation casts) for a sanity check
# ---------------------------------------------------------------------------
def encoder_reference(x, params, num_heads):
    B, N, D = x.shape
    L = int(params["wqkv"].shape[0])
    hd = D // num_heads

    def ln(t, w, b):
        mu = jnp.mean(t, -1, keepdims=True)
        var = jnp.mean((t - mu) ** 2, -1, keepdims=True)
        return (t - mu) * lax.rsqrt(var + 1e-5) * w + b

    def mm(a, w):
        return jnp.dot(a.astype(jnp.bfloat16), w, preferred_element_type=jnp.float32)

    out = x + params["pos"]
    for i in range(L):
        h_in = ln(out, params["ln1_w"][i], params["ln1_b"][i])
        qkv = mm(h_in, params["wqkv"][i]) + params["bqkv"][i]
        q, k, v = jnp.split(qkv, 3, axis=-1)
        q = q.reshape(B, N, num_heads, hd) / math.sqrt(hd)
        k = k.reshape(B, N, num_heads, hd)
        v = v.reshape(B, N, num_heads, hd)
        s = jnp.einsum("bqhd,bkhd->bhqk", q.astype(jnp.bfloat16),
                       k.astype(jnp.bfloat16), preferred_element_type=jnp.float32)
        p = jax.nn.softmax(s, axis=-1)
        o = jnp.einsum("bhqk,bkhd->bqhd", p.astype(jnp.bfloat16),
                       v.astype(jnp.bfloat16), preferred_element_type=jnp.float32)
        attn = mm(o.reshape(B, N, D), params["wo"][i]) + params["bo"][i]
        out = out + attn
        h2 = ln(out, params["ln2_w"][i], params["ln2_b"][i])
        h2 = mm(h2, params["w1"][i]) + params["b1"][i]
        h2 = 0.5 * h2 * (1.0 + lax.erf(h2 / math.sqrt(2.0)))
        out = out + mm(h2, params["w2"][i]) + params["b2"][i]
    return ln(out, params["lnf_w"], params["lnf_b"])


# ---------------------------------------------------------------------------
if __name__ == "__main__":
    # TODO(synk): dropout layers are identity (inference mode); no RNG dropout.
    B = 2
    num_patches = 7          # -> sequence length N = num_patches + 1 = 8
    emb_dim = 128            # lane-aligned embedding dim
    mlp_dim = 256
    num_heads = 4            # head_dim = 32
    num_layers = 2

    key = jax.random.PRNGKey(0)
    kx, kp = jax.random.split(key)
    N = num_patches + 1
    x = jax.random.normal(kx, (B, N, emb_dim), jnp.float32)

    params = init_params(kp, num_patches, emb_dim, mlp_dim, num_heads, num_layers)

    out = encoder_forward(x, params, num_heads)
    jax.block_until_ready(out)
    assert out.shape == (B, N, emb_dim)
    assert bool(jnp.all(jnp.isfinite(out)))

    # loose parity check vs a pure-JAX reference with matching bf16 casts
    # (bf16 weights + EUP approx reciprocal -> small expected deviation)
    ref = encoder_reference(x, params, num_heads)
    err = float(jnp.max(jnp.abs(out - ref)))
    assert err < 2e-2, f"max abs error vs reference: {err}"

    print("KERNEL_OK")
</pallas_src>

<mosaic_0001>
module attributes {stable_mosaic.version = 11 : i64} {
  func.func @_encoder_kernel(%arg0: i32, %arg1: i32, %arg2: memref<2x8x128xf32, #tpu.memory_space<vmem>>, %arg3: memref<1x8x128xf32, #tpu.memory_space<vmem>>, %arg4: memref<1x1x128xf32, #tpu.memory_space<vmem>>, %arg5: memref<1x1x128xf32, #tpu.memory_space<vmem>>, %arg6: memref<1x128x384xbf16, #tpu.memory_space<vmem>>, %arg7: memref<1x1x384xf32, #tpu.memory_space<vmem>>, %arg8: memref<1x128x128xbf16, #tpu.memory_space<vmem>>, %arg9: memref<1x1x128xf32, #tpu.memory_space<vmem>>, %arg10: memref<1x1x128xf32, #tpu.memory_space<vmem>>, %arg11: memref<1x1x128xf32, #tpu.memory_space<vmem>>, %arg12: memref<1x128x256xbf16, #tpu.memory_space<vmem>>, %arg13: memref<1x1x256xf32, #tpu.memory_space<vmem>>, %arg14: memref<1x256x128xbf16, #tpu.memory_space<vmem>>, %arg15: memref<1x1x128xf32, #tpu.memory_space<vmem>>, %arg16: memref<1x128xf32, #tpu.memory_space<vmem>>, %arg17: memref<1x128xf32, #tpu.memory_space<vmem>>, %arg18: memref<2x8x128xf32, #tpu.memory_space<vmem>>, %arg19: memref<16x128xf32, #tpu.memory_space<vmem>>, %arg20: memref<16x128xf32, #tpu.memory_space<vmem>>) attributes {dimension_semantics = [#tpu.dimension_semantics<parallel>, #tpu.dimension_semantics<arbitrary>], iteration_bounds = array<i64: 1, 2>, scalar_prefetch = 0 : i64, scratch_operands = 2 : i64, tpu.core_type = #tpu.core_type<tc>, window_params = [{transform_indices = @transform_0, window_bounds = array<i64: 2, 8, 128>}, {pipeline_mode = #tpu.pipeline_mode<synchronous>, transform_indices = @transform_1, window_bounds = array<i64: 1, 8, 128>}, {transform_indices = @transform_2, window_bounds = array<i64: 1, 1, 128>}, {transform_indices = @transform_3, window_bounds = array<i64: 1, 1, 128>}, {transform_indices = @transform_4, window_bounds = array<i64: 1, 128, 384>}, {transform_indices = @transform_5, window_bounds = array<i64: 1, 1, 384>}, {transform_indices = @transform_6, window_bounds = array<i64: 1, 128, 128>}, {transform_indices = @transform_7, window_bounds = array<i64: 1, 1, 128>}, {transform_indices = @transform_8, window_bounds = array<i64: 1, 1, 128>}, {transform_indices = @transform_9, window_bounds = array<i64: 1, 1, 128>}, {transform_indices = @transform_10, window_bounds = array<i64: 1, 128, 256>}, {transform_indices = @transform_11, window_bounds = array<i64: 1, 1, 256>}, {transform_indices = @transform_12, window_bounds = array<i64: 1, 256, 128>}, {transform_indices = @transform_13, window_bounds = array<i64: 1, 1, 128>}, {pipeline_mode = #tpu.pipeline_mode<synchronous>, transform_indices = @transform_14, window_bounds = array<i64: 1, 128>}, {pipeline_mode = #tpu.pipeline_mode<synchronous>, transform_indices = @transform_15, window_bounds = array<i64: 1, 128>}, {transform_indices = @transform_16, window_bounds = array<i64: 2, 8, 128>}]} {
    %c0_i32 = arith.constant 0 : i32
    %0 = arith.cmpi eq, %arg1, %c0_i32 : i32
    %1 = arith.extui %0 : i1 to i32
    %c0_i32_0 = arith.constant 0 : i32
    %2 = arith.cmpi ne, %1, %c0_i32_0 : i32
    scf.if %2 {
      %c0_81 = arith.constant 0 : index
      %c0_82 = arith.constant 0 : index
      %c0_83 = arith.constant 0 : index
      %191 = vector.load %arg2[%c0_81, %c0_82, %c0_83] : memref<2x8x128xf32, #tpu.memory_space<vmem>>, vector<2x8x128xf32>
      %c0_84 = arith.constant 0 : index
      %c0_85 = arith.constant 0 : index
      %c0_86 = arith.constant 0 : index
      %192 = vector.load %arg3[%c0_84, %c0_85, %c0_86] : memref<1x8x128xf32, #tpu.memory_space<vmem>>, vector<1x8x128xf32>
      %193 = vector.broadcast %192 : vector<1x8x128xf32> to vector<2x8x128xf32>
      %194 = arith.addf %191, %193 : vector<2x8x128xf32>
      %195 = vector.shape_cast %194 : vector<2x8x128xf32> to vector<16x128xf32>
      %c0_87 = arith.constant 0 : index
      %c0_88 = arith.constant 0 : index
      %196 = vector.load %arg19[%c0_87, %c0_88] : memref<16x128xf32, #tpu.memory_space<vmem>>, vector<16x128xf32>
      tpu.vector_store %arg19[%c0_87, %c0_88], %195 {strides = array<i32>} : memref<16x128xf32, #tpu.memory_space<vmem>>, vector<16x128xf32>,
    } else {
    }
    %c0 = arith.constant 0 : index
    %c0_1 = arith.constant 0 : index
    %3 = vector.load %arg19[%c0, %c0_1] : memref<16x128xf32, #tpu.memory_space<vmem>>, vector<16x128xf32>
    %c0_2 = arith.constant 0 : index
    %c0_3 = arith.constant 0 : index
    %c0_4 = arith.constant 0 : index
    %4 = vector.load %arg4[%c0_2, %c0_3, %c0_4] : memref<1x1x128xf32, #tpu.memory_space<vmem>>, vector<1x1x128xf32>
    %5 = vector.shape_cast %4 : vector<1x1x128xf32> to vector<1x128xf32>
    %c0_5 = arith.constant 0 : index
    %c0_6 = arith.constant 0 : index
    %c0_7 = arith.constant 0 : index
    %6 = vector.load %arg5[%c0_5, %c0_6, %c0_7] : memref<1x1x128xf32, #tpu.memory_space<vmem>>, vector<1x1x128xf32>
    %7 = vector.shape_cast %6 : vector<1x1x128xf32> to vector<1x128xf32>
    %cst = arith.constant dense<0.000000e+00> : vector<16xf32>
    %8 = vector.multi_reduction <add>, %3, %cst [1] : vector<16x128xf32> to vector<16xf32>
    %9 = vector.shape_cast %8 : vector<16xf32> to vector<16x1xf32>
    %cst_8 = arith.constant 1.280000e+02 : f32
    %10 = vector.broadcast %cst_8 : f32 to vector<16x1xf32>
    %11 = arith.divf %9, %10 : vector<16x1xf32>
    %12 = vector.broadcast %11 : vector<16x1xf32> to vector<16x128xf32>
    %13 = arith.subf %3, %12 : vector<16x128xf32>
    %14 = arith.mulf %13, %13 : vector<16x128xf32>
    %cst_9 = arith.constant dense<0.000000e+00> : vector<16xf32>
    %15 = vector.multi_reduction <add>, %14, %cst_9 [1] : vector<16x128xf32> to vector<16xf32>
    %16 = vector.shape_cast %15 : vector<16xf32> to vector<16x1xf32>
    %cst_10 = arith.constant 1.280000e+02 : f32
    %17 = vector.broadcast %cst_10 : f32 to vector<16x1xf32>
    %18 = arith.divf %16, %17 : vector<16x1xf32>
    %cst_11 = arith.constant 9.99999974E-6 : f32
    %19 = vector.broadcast %cst_11 : f32 to vector<16x1xf32>
    %20 = arith.addf %18, %19 : vector<16x1xf32>
    %21 = math.rsqrt %20 : vector<16x1xf32>
    %22 = vector.broadcast %21 : vector<16x1xf32> to vector<16x128xf32>
    %23 = arith.mulf %13, %22 : vector<16x128xf32>
    %24 = vector.broadcast %5 : vector<1x128xf32> to vector<16x128xf32>
    %25 = arith.mulf %23, %24 : vector<16x128xf32>
    %26 = vector.broadcast %7 : vector<1x128xf32> to vector<16x128xf32>
    %27 = arith.addf %25, %26 : vector<16x128xf32>
    %28 = arith.truncf %27 : vector<16x128xf32> to vector<16x128xbf16>
    %c0_12 = arith.constant 0 : index
    %c0_13 = arith.constant 0 : index
    %c0_14 = arith.constant 0 : index
    %29 = vector.load %arg6[%c0_12, %c0_13, %c0_14] : memref<1x128x384xbf16, #tpu.memory_space<vmem>>, vector<1x128x384xbf16>
    %30 = vector.shape_cast %29 : vector<1x128x384xbf16> to vector<128x384xbf16>
    %cst_15 = arith.constant dense<0.000000e+00> : vector<16x384xf32>
    %31 = tpu.matmul %28, %30, %cst_15 {dimension_numbers = #tpu.dot_dimension_numbers<[1], [0], [0], [1], [0, 0, 1, 1], [], []>} : vector<16x128xbf16>, vector<128x384xbf16>, vector<16x384xf32> -> vector<16x384xf32>
    %c0_16 = arith.constant 0 : index
    %c0_17 = arith.constant 0 : index
    %c0_18 = arith.constant 0 : index
    %32 = vector.load %arg7[%c0_16, %c0_17, %c0_18] : memref<1x1x384xf32, #tpu.memory_space<vmem>>, vector<1x1x384xf32>
    %33 = vector.shape_cast %32 : vector<1x1x384xf32> to vector<1x384xf32>
    %34 = vector.broadcast %33 : vector<1x384xf32> to vector<16x384xf32>
    %35 = arith.addf %31, %34 : vector<16x384xf32>
    %36 = vector.extract_strided_slice %35 {offsets = [0, 0], sizes = [16, 128], strides = [1, 1]} : vector<16x384xf32> to vector<16x128xf32>
    %cst_19 = arith.constant 0.176776692 : f32
    %37 = vector.broadcast %cst_19 : f32 to vector<16x128xf32>
    %38 = arith.mulf %36, %37 : vector<16x128xf32>
    %39 = arith.truncf %38 : vector<16x128xf32> to vector<16x128xbf16>
    %40 = vector.extract_strided_slice %35 {offsets = [0, 128], sizes = [16, 128], strides = [1, 1]} : vector<16x384xf32> to vector<16x128xf32>
    %41 = arith.truncf %40 : vector<16x128xf32> to vector<16x128xbf16>
    %42 = vector.extract_strided_slice %35 {offsets = [0, 256], sizes = [16, 128], strides = [1, 1]} : vector<16x384xf32> to vector<16x128xf32>
    %43 = arith.truncf %42 : vector<16x128xf32> to vector<16x128xbf16>
    %44 = vector.extract_strided_slice %39 {offsets = [0, 0], sizes = [16, 32], strides = [1, 1]} : vector<16x128xbf16> to vector<16x32xbf16>
    %45 = vector.shape_cast %44 : vector<16x32xbf16> to vector<2x8x32xbf16>
    %46 = vector.extract_strided_slice %41 {offsets = [0, 0], sizes = [16, 32], strides = [1, 1]} : vector<16x128xbf16> to vector<16x32xbf16>
    %47 = vector.shape_cast %46 : vector<16x32xbf16> to vector<2x8x32xbf16>
    %48 = vector.extract_strided_slice %43 {offsets = [0, 0], sizes = [16, 32], strides = [1, 1]} : vector<16x128xbf16> to vector<16x32xbf16>
    %49 = vector.shape_cast %48 : vector<16x32xbf16> to vector<2x8x32xbf16>
    "tpu.trace_start"() <{level = 10 : i32, message = "bqd,bkd->bqk"}> : () -> ()
    %cst_20 = arith.constant dense<0.000000e+00> : vector<2x8x8xf32>
    %50 = tpu.matmul %45, %47, %cst_20 {dimension_numbers = #tpu.dot_dimension_numbers<[2], [2], [1], [1], [0, 0, 0, 1, 1, 1], [0], [0]>} : vector<2x8x32xbf16>, vector<2x8x32xbf16>, vector<2x8x8xf32> -> vector<2x8x8xf32>
    "tpu.trace_stop"() : () -> ()
    %cst_21 = arith.constant dense<0xFF800000> : vector<2x8xf32>
    %51 = vector.multi_reduction <maximumf>, %50, %cst_21 [2] : vector<2x8x8xf32> to vector<2x8xf32>
    %52 = vector.shape_cast %51 : vector<2x8xf32> to vector<2x8x1xf32>
    %53 = vector.broadcast %52 : vector<2x8x1xf32> to vector<2x8x8xf32>
    %54 = arith.subf %50, %53 : vector<2x8x8xf32>
    %55 = math.exp %54 : vector<2x8x8xf32>
    %cst_22 = arith.constant dense<0.000000e+00> : vector<2x8xf32>
    %56 = vector.multi_reduction <add>, %55, %cst_22 [2] : vector<2x8x8xf32> to vector<2x8xf32>
    %57 = vector.shape_cast %56 : vector<2x8xf32> to vector<2x8x1xf32>
    %58 = tpu.reciprocal %57 {approx = true} : vector<2x8x1xf32> -> vector<2x8x1xf32>
    %59 = vector.broadcast %58 : vector<2x8x1xf32> to vector<2x8x8xf32>
    %60 = arith.mulf %55, %59 : vector<2x8x8xf32>
    %61 = arith.truncf %60 : vector<2x8x8xf32> to vector<2x8x8xbf16>
    "tpu.trace_start"() <{level = 10 : i32, message = "bqk,bkd->bqd"}> : () -> ()
    %cst_23 = arith.constant dense<0.000000e+00> : vector<2x8x32xf32>
    %62 = tpu.matmul %61, %49, %cst_23 {dimension_numbers = #tpu.dot_dimension_numbers<[2], [1], [1], [2], [0, 0, 0, 1, 1, 2], [0], [0]>} : vector<2x8x8xbf16>, vector<2x8x32xbf16>, vector<2x8x32xf32> -> vector<2x8x32xf32>
    "tpu.trace_stop"() : () -> ()
    %63 = vector.shape_cast %62 : vector<2x8x32xf32> to vector<16x32xf32>
    %c0_24 = arith.constant 0 : index
    %c0_25 = arith.constant 0 : index
    %64 = vector.load %arg20[%c0_24, %c0_25] : memref<16x128xf32, #tpu.memory_space<vmem>>, vector<16x32xf32>
    tpu.vector_store %arg20[%c0_24, %c0_25], %63 {strides = array<i32>} : memref<16x128xf32, #tpu.memory_space<vmem>>, vector<16x32xf32>,
    %65 = vector.extract_strided_slice %39 {offsets = [0, 32], sizes = [16, 32], strides = [1, 1]} : vector<16x128xbf16> to vector<16x32xbf16>
    %66 = vector.shape_cast %65 : vector<16x32xbf16> to vector<2x8x32xbf16>
    %67 = vector.extract_strided_slice %41 {offsets = [0, 32], sizes = [16, 32], strides = [1, 1]} : vector<16x128xbf16> to vector<16x32xbf16>
    %68 = vector.shape_cast %67 : vector<16x32xbf16> to vector<2x8x32xbf16>
    %69 = vector.extract_strided_slice %43 {offsets = [0, 32], sizes = [16, 32], strides = [1, 1]} : vector<16x128xbf16> to vector<16x32xbf16>
    %70 = vector.shape_cast %69 : vector<16x32xbf16> to vector<2x8x32xbf16>
    "tpu.trace_start"() <{level = 10 : i32, message = "bqd,bkd->bqk"}> : () -> ()
    %cst_26 = arith.constant dense<0.000000e+00> : vector<2x8x8xf32>
    %71 = tpu.matmul %66, %68, %cst_26 {dimension_numbers = #tpu.dot_dimension_numbers<[2], [2], [1], [1], [0, 0, 0, 1, 1, 1], [0], [0]>} : vector<2x8x32xbf16>, vector<2x8x32xbf16>, vector<2x8x8xf32> -> vector<2x8x8xf32>
    "tpu.trace_stop"() : () -> ()
    %cst_27 = arith.constant dense<0xFF800000> : vector<2x8xf32>
    %72 = vector.multi_reduction <maximumf>, %71, %cst_27 [2] : vector<2x8x8xf32> to vector<2x8xf32>
    %73 = vector.shape_cast %72 : vector<2x8xf32> to vector<2x8x1xf32>
    %74 = vector.broadcast %73 : vector<2x8x1xf32> to vector<2x8x8xf32>
    %75 = arith.subf %71, %74 : vector<2x8x8xf32>
    %76 = math.exp %75 : vector<2x8x8xf32>
    %cst_28 = arith.constant dense<0.000000e+00> : vector<2x8xf32>
    %77 = vector.multi_reduction <add>, %76, %cst_28 [2] : vector<2x8x8xf32> to vector<2x8xf32>
    %78 = vector.shape_cast %77 : vector<2x8xf32> to vector<2x8x1xf32>
    %79 = tpu.reciprocal %78 {approx = true} : vector<2x8x1xf32> -> vector<2x8x1xf32>
    %80 = vector.broadcast %79 : vector<2x8x1xf32> to vector<2x8x8xf32>
    %81 = arith.mulf %76, %80 : vector<2x8x8xf32>
    %82 = arith.truncf %81 : vector<2x8x8xf32> to vector<2x8x8xbf16>
    "tpu.trace_start"() <{level = 10 : i32, message = "bqk,bkd->bqd"}> : () -> ()
    %cst_29 = arith.constant dense<0.000000e+00> : vector<2x8x32xf32>
    %83 = tpu.matmul %82, %70, %cst_29 {dimension_numbers = #tpu.dot_dimension_numbers<[2], [1], [1], [2], [0, 0, 0, 1, 1, 2], [0], [0]>} : vector<2x8x8xbf16>, vector<2x8x32xbf16>, vector<2x8x32xf32> -> vector<2x8x32xf32>
    "tpu.trace_stop"() : () -> ()
    %84 = vector.shape_cast %83 : vector<2x8x32xf32> to vector<16x32xf32>
    %c0_30 = arith.constant 0 : index
    %c32 = arith.constant 32 : index
    %85 = vector.load %arg20[%c0_30, %c32] : memref<16x128xf32, #tpu.memory_space<vmem>>, vector<16x32xf32>
    tpu.vector_store %arg20[%c0_30, %c32], %84 {strides = array<i32>} : memref<16x128xf32, #tpu.memory_space<vmem>>, vector<16x32xf32>,
    %86 = vector.extract_strided_slice %39 {offsets = [0, 64], sizes = [16, 32], strides = [1, 1]} : vector<16x128xbf16> to vector<16x32xbf16>
    %87 = vector.shape_cast %86 : vector<16x32xbf16> to vector<2x8x32xbf16>
    %88 = vector.extract_strided_slice %41 {offsets = [0, 64], sizes = [16, 32], strides = [1, 1]} : vector<16x128xbf16> to vector<16x32xbf16>
    %89 = vector.shape_cast %88 : vector<16x32xbf16> to vector<2x8x32xbf16>
    %90 = vector.extract_strided_slice %43 {offsets = [0, 64], sizes = [16, 32], strides = [1, 1]} : vector<16x128xbf16> to vector<16x32xbf16>
    %91 = vector.shape_cast %90 : vector<16x32xbf16> to vector<2x8x32xbf16>
    "tpu.trace_start"() <{level = 10 : i32, message = "bqd,bkd->bqk"}> : () -> ()
    %cst_31 = arith.constant dense<0.000000e+00> : vector<2x8x8xf32>
    %92 = tpu.matmul %87, %89, %cst_31 {dimension_numbers = #tpu.dot_dimension_numbers<[2], [2], [1], [1], [0, 0, 0, 1, 1, 1], [0], [0]>} : vector<2x8x32xbf16>, vector<2x8x32xbf16>, vector<2x8x8xf32> -> vector<2x8x8xf32>
    "tpu.trace_stop"() : () -> ()
    %cst_32 = arith.constant dense<0xFF800000> : vector<2x8xf32>
    %93 = vector.multi_reduction <maximumf>, %92, %cst_32 [2] : vector<2x8x8xf32> to vector<2x8xf32>
    %94 = vector.shape_cast %93 : vector<2x8xf32> to vector<2x8x1xf32>
    %95 = vector.broadcast %94 : vector<2x8x1xf32> to vector<2x8x8xf32>
    %96 = arith.subf %92, %95 : vector<2x8x8xf32>
    %97 = math.exp %96 : vector<2x8x8xf32>
    %cst_33 = arith.constant dense<0.000000e+00> : vector<2x8xf32>
    %98 = vector.multi_reduction <add>, %97, %cst_33 [2] : vector<2x8x8xf32> to vector<2x8xf32>
    %99 = vector.shape_cast %98 : vector<2x8xf32> to vector<2x8x1xf32>
    %100 = tpu.reciprocal %99 {approx = true} : vector<2x8x1xf32> -> vector<2x8x1xf32>
    %101 = vector.broadcast %100 : vector<2x8x1xf32> to vector<2x8x8xf32>
    %102 = arith.mulf %97, %101 : vector<2x8x8xf32>
    %103 = arith.truncf %102 : vector<2x8x8xf32> to vector<2x8x8xbf16>
    "tpu.trace_start"() <{level = 10 : i32, message = "bqk,bkd->bqd"}> : () -> ()
    %cst_34 = arith.constant dense<0.000000e+00> : vector<2x8x32xf32>
    %104 = tpu.matmul %103, %91, %cst_34 {dimension_numbers = #tpu.dot_dimension_numbers<[2], [1], [1], [2], [0, 0, 0, 1, 1, 2], [0], [0]>} : vector<2x8x8xbf16>, vector<2x8x32xbf16>, vector<2x8x32xf32> -> vector<2x8x32xf32>
    "tpu.trace_stop"() : () -> ()
    %105 = vector.shape_cast %104 : vector<2x8x32xf32> to vector<16x32xf32>
    %c0_35 = arith.constant 0 : index
    %c64 = arith.constant 64 : index
    %106 = vector.load %arg20[%c0_35, %c64] : memref<16x128xf32, #tpu.memory_space<vmem>>, vector<16x32xf32>
    tpu.vector_store %arg20[%c0_35, %c64], %105 {strides = array<i32>} : memref<16x128xf32, #tpu.memory_space<vmem>>, vector<16x32xf32>,
    %107 = vector.extract_strided_slice %39 {offsets = [0, 96], sizes = [16, 32], strides = [1, 1]} : vector<16x128xbf16> to vector<16x32xbf16>
    %108 = vector.shape_cast %107 : vector<16x32xbf16> to vector<2x8x32xbf16>
    %109 = vector.extract_strided_slice %41 {offsets = [0, 96], sizes = [16, 32], strides = [1, 1]} : vector<16x128xbf16> to vector<16x32xbf16>
    %110 = vector.shape_cast %109 : vector<16x32xbf16> to vector<2x8x32xbf16>
    %111 = vector.extract_strided_slice %43 {offsets = [0, 96], sizes = [16, 32], strides = [1, 1]} : vector<16x128xbf16> to vector<16x32xbf16>
    %112 = vector.shape_cast %111 : vector<16x32xbf16> to vector<2x8x32xbf16>
    "tpu.trace_start"() <{level = 10 : i32, message = "bqd,bkd->bqk"}> : () -> ()
    %cst_36 = arith.constant dense<0.000000e+00> : vector<2x8x8xf32>
    %113 = tpu.matmul %108, %110, %cst_36 {dimension_numbers = #tpu.dot_dimension_numbers<[2], [2], [1], [1], [0, 0, 0, 1, 1, 1], [0], [0]>} : vector<2x8x32xbf16>, vector<2x8x32xbf16>, vector<2x8x8xf32> -> vector<2x8x8xf32>
    "tpu.trace_stop"() : () -> ()
    %cst_37 = arith.constant dense<0xFF800000> : vector<2x8xf32>
    %114 = vector.multi_reduction <maximumf>, %113, %cst_37 [2] : vector<2x8x8xf32> to vector<2x8xf32>
    %115 = vector.shape_cast %114 : vector<2x8xf32> to vector<2x8x1xf32>
    %116 = vector.broadcast %115 : vector<2x8x1xf32> to vector<2x8x8xf32>
    %117 = arith.subf %113, %116 : vector<2x8x8xf32>
    %118 = math.exp %117 : vector<2x8x8xf32>
    %cst_38 = arith.constant dense<0.000000e+00> : vector<2x8xf32>
    %119 = vector.multi_reduction <add>, %118, %cst_38 [2] : vector<2x8x8xf32> to vector<2x8xf32>
    %120 = vector.shape_cast %119 : vector<2x8xf32> to vector<2x8x1xf32>
    %121 = tpu.reciprocal %120 {approx = true} : vector<2x8x1xf32> -> vector<2x8x1xf32>
    %122 = vector.broadcast %121 : vector<2x8x1xf32> to vector<2x8x8xf32>
    %123 = arith.mulf %118, %122 : vector<2x8x8xf32>
    %124 = arith.truncf %123 : vector<2x8x8xf32> to vector<2x8x8xbf16>
    "tpu.trace_start"() <{level = 10 : i32, message = "bqk,bkd->bqd"}> : () -> ()
    %cst_39 = arith.constant dense<0.000000e+00> : vector<2x8x32xf32>
    %125 = tpu.matmul %124, %112, %cst_39 {dimension_numbers = #tpu.dot_dimension_numbers<[2], [1], [1], [2], [0, 0, 0, 1, 1, 2], [0], [0]>} : vector<2x8x8xbf16>, vector<2x8x32xbf16>, vector<2x8x32xf32> -> vector<2x8x32xf32>
    "tpu.trace_stop"() : () -> ()
    %126 = vector.shape_cast %125 : vector<2x8x32xf32> to vector<16x32xf32>
    %c0_40 = arith.constant 0 : index
    %c96 = arith.constant 96 : index
    %127 = vector.load %arg20[%c0_40, %c96] : memref<16x128xf32, #tpu.memory_space<vmem>>, vector<16x32xf32>
    tpu.vector_store %arg20[%c0_40, %c96], %126 {strides = array<i32>} : memref<16x128xf32, #tpu.memory_space<vmem>>, vector<16x32xf32>,
    %c0_41 = arith.constant 0 : index
    %c0_42 = arith.constant 0 : index
    %128 = vector.load %arg20[%c0_41, %c0_42] : memref<16x128xf32, #tpu.memory_space<vmem>>, vector<16x128xf32>
    %129 = arith.truncf %128 : vector<16x128xf32> to vector<16x128xbf16>
    %c0_43 = arith.constant 0 : index
    %c0_44 = arith.constant 0 : index
    %c0_45 = arith.constant 0 : index
    %130 = vector.load %arg8[%c0_43, %c0_44, %c0_45] : memref<1x128x128xbf16, #tpu.memory_space<vmem>>, vector<1x128x128xbf16>
    %131 = vector.shape_cast %130 : vector<1x128x128xbf16> to vector<128x128xbf16>
    %cst_46 = arith.constant dense<0.000000e+00> : vector<16x128xf32>
    %132 = tpu.matmul %129, %131, %cst_46 {dimension_numbers = #tpu.dot_dimension_numbers<[1], [0], [0], [1], [0, 0, 1, 1], [], []>} : vector<16x128xbf16>, vector<128x128xbf16>, vector<16x128xf32> -> vector<16x128xf32>
    %c0_47 = arith.constant 0 : index
    %c0_48 = arith.constant 0 : index
    %c0_49 = arith.constant 0 : index
    %133 = vector.load %arg9[%c0_47, %c0_48, %c0_49] : memref<1x1x128xf32, #tpu.memory_space<vmem>>, vector<1x1x128xf32>
    %134 = vector.shape_cast %133 : vector<1x1x128xf32> to vector<1x128xf32>
    %135 = vector.broadcast %134 : vector<1x128xf32> to vector<16x128xf32>
    %136 = arith.addf %132, %135 : vector<16x128xf32>
    %137 = arith.addf %3, %136 : vector<16x128xf32>
    %c0_50 = arith.constant 0 : index
    %c0_51 = arith.constant 0 : index
    %c0_52 = arith.constant 0 : index
    %138 = vector.load %arg10[%c0_50, %c0_51, %c0_52] : memref<1x1x128xf32, #tpu.memory_space<vmem>>, vector<1x1x128xf32>
    %139 = vector.shape_cast %138 : vector<1x1x128xf32> to vector<1x128xf32>
    %c0_53 = arith.constant 0 : index
    %c0_54 = arith.constant 0 : index
    %c0_55 = arith.constant 0 : index
    %140 = vector.load %arg11[%c0_53, %c0_54, %c0_55] : memref<1x1x128xf32, #tpu.memory_space<vmem>>, vector<1x1x128xf32>
    %141 = vector.shape_cast %140 : vector<1x1x128xf32> to vector<1x128xf32>
    %cst_56 = arith.constant dense<0.000000e+00> : vector<16xf32>
    %142 = vector.multi_reduction <add>, %137, %cst_56 [1] : vector<16x128xf32> to vector<16xf32>
    %143 = vector.shape_cast %142 : vector<16xf32> to vector<16x1xf32>
    %cst_57 = arith.constant 1.280000e+02 : f32
    %144 = vector.broadcast %cst_57 : f32 to vector<16x1xf32>
    %145 = arith.divf %143, %144 : vector<16x1xf32>
    %146 = vector.broadcast %145 : vector<16x1xf32> to vector<16x128xf32>
    %147 = arith.subf %137, %146 : vector<16x128xf32>
    %148 = arith.mulf %147, %147 : vector<16x128xf32>
    %cst_58 = arith.constant dense<0.000000e+00> : vector<16xf32>
    %149 = vector.multi_reduction <add>, %148, %cst_58 [1] : vector<16x128xf32> to vector<16xf32>
    %150 = vector.shape_cast %149 : vector<16xf32> to vector<16x1xf32>
    %cst_59 = arith.constant 1.280000e+02 : f32
    %151 = vector.broadcast %cst_59 : f32 to vector<16x1xf32>
    %152 = arith.divf %150, %151 : vector<16x1xf32>
    %cst_60 = arith.constant 9.99999974E-6 : f32
    %153 = vector.broadcast %cst_60 : f32 to vector<16x1xf32>
    %154 = arith.addf %152, %153 : vector<16x1xf32>
    %155 = math.rsqrt %154 : vector<16x1xf32>
    %156 = vector.broadcast %155 : vector<16x1xf32> to vector<16x128xf32>
    %157 = arith.mulf %147, %156 : vector<16x128xf32>
    %158 = vector.broadcast %139 : vector<1x128xf32> to vector<16x128xf32>
    %159 = arith.mulf %157, %158 : vector<16x128xf32>
    %160 = vector.broadcast %141 : vector<1x128xf32> to vector<16x128xf32>
    %161 = arith.addf %159, %160 : vector<16x128xf32>
    %162 = arith.truncf %161 : vector<16x128xf32> to vector<16x128xbf16>
    %c0_61 = arith.constant 0 : index
    %c0_62 = arith.constant 0 : index
    %c0_63 = arith.constant 0 : index
    %163 = vector.load %arg12[%c0_61, %c0_62, %c0_63] : memref<1x128x256xbf16, #tpu.memory_space<vmem>>, vector<1x128x256xbf16>
    %164 = vector.shape_cast %163 : vector<1x128x256xbf16> to vector<128x256xbf16>
    %cst_64 = arith.constant dense<0.000000e+00> : vector<16x256xf32>
    %165 = tpu.matmul %162, %164, %cst_64 {dimension_numbers = #tpu.dot_dimension_numbers<[1], [0], [0], [1], [0, 0, 1, 1], [], []>} : vector<16x128xbf16>, vector<128x256xbf16>, vector<16x256xf32> -> vector<16x256xf32>
    %c0_65 = arith.constant 0 : index
    %c0_66 = arith.constant 0 : index
    %c0_67 = arith.constant 0 : index
    %166 = vector.load %arg13[%c0_65, %c0_66, %c0_67] : memref<1x1x256xf32, #tpu.memory_space<vmem>>, vector<1x1x256xf32>
    %167 = vector.shape_cast %166 : vector<1x1x256xf32> to vector<1x256xf32>
    %168 = vector.broadcast %167 : vector<1x256xf32> to vector<16x256xf32>
    %169 = arith.addf %165, %168 : vector<16x256xf32>
    %cst_68 = arith.constant 5.000000e-01 : f32
    %170 = vector.broadcast %cst_68 : f32 to vector<16x256xf32>
    %171 = arith.mulf %170, %169 : vector<16x256xf32>
    %cst_69 = arith.constant 0.707106769 : f32
    %172 = vector.broadcast %cst_69 : f32 to vector<16x256xf32>
    %173 = arith.mulf %169, %172 : vector<16x256xf32>
    %174 = math.erf %173 : vector<16x256xf32>
    %cst_70 = arith.constant 1.000000e+00 : f32
    %175 = vector.broadcast %cst_70 : f32 to vector<16x256xf32>
    %176 = arith.addf %175, %174 : vector<16x256xf32>
    %177 = arith.mulf %171, %176 : vector<16x256xf32>
    %178 = arith.truncf %177 : vector<16x256xf32> to vector<16x256xbf16>
    %c0_71 = arith.constant 0 : index
    %c0_72 = arith.constant 0 : index
    %c0_73 = arith.constant 0 : index
    %179 = vector.load %arg14[%c0_71, %c0_72, %c0_73] : memref<1x256x128xbf16, #tpu.memory_space<vmem>>, vector<1x256x128xbf16>
    %180 = vector.shape_cast %179 : vector<1x256x128xbf16> to vector<256x128xbf16>
    %cst_74 = arith.constant dense<0.000000e+00> : vector<16x128xf32>
    %181 = tpu.matmul %178, %180, %cst_74 {dimension_numbers = #tpu.dot_dimension_numbers<[1], [0], [0], [1], [0, 0, 1, 1], [], []>} : vector<16x256xbf16>, vector<256x128xbf16>, vector<16x128xf32> -> vector<16x128xf32>
    %c0_75 = arith.constant 0 : index
    %c0_76 = arith.constant 0 : index
    %c0_77 = arith.constant 0 : index
    %182 = vector.load %arg15[%c0_75, %c0_76, %c0_77] : memref<1x1x128xf32, #tpu.memory_space<vmem>>, vector<1x1x128xf32>
    %183 = vector.shape_cast %182 : vector<1x1x128xf32> to vector<1x128xf32>
    %184 = vector.broadcast %183 : vector<1x128xf32> to vector<16x128xf32>
    %185 = arith.addf %181, %184 : vector<16x128xf32>
    %186 = arith.addf %137, %185 : vector<16x128xf32>
    %c0_78 = arith.constant 0 : index
    %c0_79 = arith.constant 0 : index
    %187 = vector.load %arg19[%c0_78, %c0_79] : memref<16x128xf32, #tpu.memory_space<vmem>>, vector<16x128xf32>
    tpu.vector_store %arg19[%c0_78, %c0_79], %186 {strides = array<i32>} : memref<16x128xf32, #tpu.memory_space<vmem>>, vector<16x128xf32>,
    %c1_i32 = arith.constant 1 : i32
    %188 = arith.cmpi eq, %arg1, %c1_i32 : i32
    %189 = arith.extui %188 : i1 to i32
    %c0_i32_80 = arith.constant 0 : i32
    %190 = arith.cmpi ne, %189, %c0_i32_80 : i32
    scf.if %190 {
      %c0_81 = arith.constant 0 : index
      %c0_82 = arith.constant 0 : index
      %191 = vector.load %arg16[%c0_81, %c0_82] : memref<1x128xf32, #tpu.memory_space<vmem>>, vector<1x128xf32>
      %c0_83 = arith.constant 0 : index
      %c0_84 = arith.constant 0 : index
      %192 = vector.load %arg17[%c0_83, %c0_84] : memref<1x128xf32, #tpu.memory_space<vmem>>, vector<1x128xf32>
      %cst_85 = arith.constant dense<0.000000e+00> : vector<16xf32>
      %193 = vector.multi_reduction <add>, %186, %cst_85 [1] : vector<16x128xf32> to vector<16xf32>
      %194 = vector.shape_cast %193 : vector<16xf32> to vector<16x1xf32>
      %cst_86 = arith.constant 1.280000e+02 : f32
      %195 = vector.broadcast %cst_86 : f32 to vector<16x1xf32>
      %196 = arith.divf %194, %195 : vector<16x1xf32>
      %197 = vector.broadcast %196 : vector<16x1xf32> to vector<16x128xf32>
      %198 = arith.subf %186, %197 : vector<16x128xf32>
      %199 = arith.mulf %198, %198 : vector<16x128xf32>
      %cst_87 = arith.constant dense<0.000000e+00> : vector<16xf32>
      %200 = vector.multi_reduction <add>, %199, %cst_87 [1] : vector<16x128xf32> to vector<16xf32>
      %201 = vector.shape_cast %200 : vector<16xf32> to vector<16x1xf32>
      %cst_88 = arith.constant 1.280000e+02 : f32
      %202 = vector.broadcast %cst_88 : f32 to vector<16x1xf32>
      %203 = arith.divf %201, %202 : vector<16x1xf32>
      %cst_89 = arith.constant 9.99999974E-6 : f32
      %204 = vector.broadcast %cst_89 : f32 to vector<16x1xf32>
      %205 = arith.addf %203, %204 : vector<16x1xf32>
      %206 = math.rsqrt %205 : vector<16x1xf32>
      %207 = vector.broadcast %206 : vector<16x1xf32> to vector<16x128xf32>
      %208 = arith.mulf %198, %207 : vector<16x128xf32>
      %209 = vector.broadcast %191 : vector<1x128xf32> to vector<16x128xf32>
      %210 = arith.mulf %208, %209 : vector<16x128xf32>
      %211 = vector.broadcast %192 : vector<1x128xf32> to vector<16x128xf32>
      %212 = arith.addf %210, %211 : vector<16x128xf32>
      %213 = vector.shape_cast %212 : vector<16x128xf32> to vector<2x8x128xf32>
      %c0_90 = arith.constant 0 : index
      %c0_91 = arith.constant 0 : index
      %c0_92 = arith.constant 0 : index
      %214 = vector.load %arg18[%c0_90, %c0_91, %c0_92] : memref<2x8x128xf32, #tpu.memory_space<vmem>>, vector<2x8x128xf32>
      tpu.vector_store %arg18[%c0_90, %c0_91, %c0_92], %213 {strides = array<i32>} : memref<2x8x128xf32, #tpu.memory_space<vmem>>, vector<2x8x128xf32>,
    } else {
    }
    return
  }
  func.func @transform_0(%arg0: i32, %arg1: i32) -> (i32, i32, i32) {
    %c0_i32 = arith.constant 0 : i32
    %c0_i32_0 = arith.constant 0 : i32
    %c0_i32_1 = arith.constant 0 : i32
    return %arg0, %c0_i32, %c0_i32_0 : i32, i32, i32
  }
  func.func @transform_1(%arg0: i32, %arg1: i32) -> (i32, i32, i32) {
    %c0_i32 = arith.constant 0 : i32
    %c0_i32_0 = arith.constant 0 : i32
    %c0_i32_1 = arith.constant 0 : i32
    %c0_i32_2 = arith.constant 0 : i32
    return %c0_i32, %c0_i32_0, %c0_i32_1 : i32, i32, i32
  }
  func.func @transform_2(%arg0: i32, %arg1: i32) -> (i32, i32, i32) {
    %c0_i32 = arith.constant 0 : i32
    %c0_i32_0 = arith.constant 0 : i32
    %c0_i32_1 = arith.constant 0 : i32
    return %arg1, %c0_i32, %c0_i32_0 : i32, i32, i32
  }
  func.func @transform_3(%arg0: i32, %arg1: i32) -> (i32, i32, i32) {
    %c0_i32 = arith.constant 0 : i32
    %c0_i32_0 = arith.constant 0 : i32
    %c0_i32_1 = arith.constant 0 : i32
    return %arg1, %c0_i32, %c0_i32_0 : i32, i32, i32
  }
  func.func @transform_4(%arg0: i32, %arg1: i32) -> (i32, i32, i32) {
    %c0_i32 = arith.constant 0 : i32
    %c0_i32_0 = arith.constant 0 : i32
    %c0_i32_1 = arith.constant 0 : i32
    return %arg1, %c0_i32, %c0_i32_0 : i32, i32, i32
  }
  func.func @transform_5(%arg0: i32, %arg1: i32) -> (i32, i32, i32) {
    %c0_i32 = arith.constant 0 : i32
    %c0_i32_0 = arith.constant 0 : i32
    %c0_i32_1 = arith.constant 0 : i32
    return %arg1, %c0_i32, %c0_i32_0 : i32, i32, i32
  }
  func.func @transform_6(%arg0: i32, %arg1: i32) -> (i32, i32, i32) {
    %c0_i32 = arith.constant 0 : i32
    %c0_i32_0 = arith.constant 0 : i32
    %c0_i32_1 = arith.constant 0 : i32
    return %arg1, %c0_i32, %c0_i32_0 : i32, i32, i32
  }
  func.func @transform_7(%arg0: i32, %arg1: i32) -> (i32, i32, i32) {
    %c0_i32 = arith.constant 0 : i32
    %c0_i32_0 = arith.constant 0 : i32
    %c0_i32_1 = arith.constant 0 : i32
    return %arg1, %c0_i32, %c0_i32_0 : i32, i32, i32
  }
  func.func @transform_8(%arg0: i32, %arg1: i32) -> (i32, i32, i32) {
    %c0_i32 = arith.constant 0 : i32
    %c0_i32_0 = arith.constant 0 : i32
    %c0_i32_1 = arith.constant 0 : i32
    return %arg1, %c0_i32, %c0_i32_0 : i32, i32, i32
  }
  func.func @transform_9(%arg0: i32, %arg1: i32) -> (i32, i32, i32) {
    %c0_i32 = arith.constant 0 : i32
    %c0_i32_0 = arith.constant 0 : i32
    %c0_i32_1 = arith.constant 0 : i32
    return %arg1, %c0_i32, %c0_i32_0 : i32, i32, i32
  }
  func.func @transform_10(%arg0: i32, %arg1: i32) -> (i32, i32, i32) {
    %c0_i32 = arith.constant 0 : i32
    %c0_i32_0 = arith.constant 0 : i32
    %c0_i32_1 = arith.constant 0 : i32
    return %arg1, %c0_i32, %c0_i32_0 : i32, i32, i32
  }
  func.func @transform_11(%arg0: i32, %arg1: i32) -> (i32, i32, i32) {
    %c0_i32 = arith.constant 0 : i32
    %c0_i32_0 = arith.constant 0 : i32
    %c0_i32_1 = arith.constant 0 : i32
    return %arg1, %c0_i32, %c0_i32_0 : i32, i32, i32
  }
  func.func @transform_12(%arg0: i32, %arg1: i32) -> (i32, i32, i32) {
    %c0_i32 = arith.constant 0 : i32
    %c0_i32_0 = arith.constant 0 : i32
    %c0_i32_1 = arith.constant 0 : i32
    return %arg1, %c0_i32, %c0_i32_0 : i32, i32, i32
  }
  func.func @transform_13(%arg0: i32, %arg1: i32) -> (i32, i32, i32) {
    %c0_i32 = arith.constant 0 : i32
    %c0_i32_0 = arith.constant 0 : i32
    %c0_i32_1 = arith.constant 0 : i32
    return %arg1, %c0_i32, %c0_i32_0 : i32, i32, i32
  }
  func.func @transform_14(%arg0: i32, %arg1: i32) -> (i32, i32) {
    %c0_i32 = arith.constant 0 : i32
    %c0_i32_0 = arith.constant 0 : i32
    %c0_i32_1 = arith.constant 0 : i32
    return %c0_i32, %c0_i32_0 : i32, i32
  }
  func.func @transform_15(%arg0: i32, %arg1: i32) -> (i32, i32) {
    %c0_i32 = arith.constant 0 : i32
    %c0_i32_0 = arith.constant 0 : i32
    %c0_i32_1 = arith.constant 0 : i32
    return %c0_i32, %c0_i32_0 : i32, i32
  }
  func.func @transform_16(%arg0: i32, %arg1: i32) -> (i32, i32, i32) {
    %c0_i32 = arith.constant 0 : i32
    %c0_i32_0 = arith.constant 0 : i32
    %c0_i32_1 = arith.constant 0 : i32
    return %arg0, %c0_i32, %c0_i32_0 : i32, i32, i32
  }
}

</mosaic_0001>

<bundles_post_ra>
// kernel: tpu_custom_call.1
= control target key start
LH: loop header
LB: loop body
LE: loop exit
PB: predicated region body
PF: predicated region fallthrough
CT: control target
= control target key end

     0   :  { %s4681_s0 = inlined_call_operand.hbm [shape: f32[2,8,128], index: 0, kind: input, shape index: {}]   ;;  %s4682_s1 = inlined_call_operand.hbm [shape: f32[1,8,128], index: 1, kind: input, shape index: {}]   ;;  %s4683_s2 = inlined_call_operand.hbm [shape: f32[2,1,128], index: 2, kind: input, shape index: {}]   ;;  %s4684_s3 = inlined_call_operand.hbm [shape: f32[2,1,128], index: 3, kind: input, shape index: {}]   ;;  %s4685_s4 = inlined_call_operand.hbm [shape: bf16[2,128,384], index: 4, kind: input, shape index: {}]   ;;  %s4686_s5 = inlined_call_operand.vmem [shape: f32[2,1,384], index: 5, kind: input, shape index: {}]   ;;  %s4687_s6 = inlined_call_operand.hbm [shape: bf16[2,128,128], index: 6, kind: input, shape index: {}]   ;;  %s4688_s7 = inlined_call_operand.vmem [shape: f32[2,1,128], index: 7, kind: input, shape index: {}]   ;;  %s4689_s8 = inlined_call_operand.vmem [shape: f32[2,1,128], index: 8, kind: input, shape index: {}]   ;;  %s4690_s9 = inlined_call_operand.vmem [shape: f32[2,1,128], index: 9, kind: input, shape index: {}]   ;;  %s4691_s10 = inlined_call_operand.hbm [shape: bf16[2,128,256], index: 10, kind: input, shape index: {}]   ;;  %s4692_s11 = inlined_call_operand.vmem [shape: f32[2,1,256], index: 11, kind: input, shape index: {}]   ;;  %s4693_s12 = inlined_call_operand.hbm [shape: bf16[2,256,128], index: 12, kind: input, shape index: {}]   ;;  %s4694_s13 = inlined_call_operand.vmem [shape: f32[2,1,128], index: 13, kind: input, shape index: {}]   ;;  %s4695_s14 = inlined_call_operand.vmem [shape: f32[1,128], index: 14, kind: input, shape index: {}]   ;;  %s4696_s15 = inlined_call_operand.vmem [shape: f32[1,128], index: 15, kind: input, shape index: {}]   ;;  %s4697_s16 = inlined_call_operand.hbm [shape: f32[2,8,128], index: 16, kind: output, shape index: {}]  }
   0x1   :  { %4720 = sst [smem:[#allocation24_spill]] %s4681_s0 }
   0x2   :  { %4721 = sst [smem:[#allocation25_spill]] %s4682_s1 }
   0x3   :  { %4722 = sst [smem:[#allocation26_spill]] %s4683_s2 }
   0x4   :  { %4723 = sst [smem:[#allocation27_spill]] %s4684_s3 }
   0x5   :  { %4724 = sst [smem:[#allocation28_spill]] %s4685_s4 }
   0x6   :  { %4725 = sst [smem:[#allocation29_spill]] %s4686_s5 }
   0x7   :  { %4726 = sst [smem:[#allocation30_spill]] %s4687_s6 }
   0x8   :  { %4727 = sst [smem:[#allocation31_spill]] %s4688_s7 }
   0x9   :  { %4728 = sst [smem:[#allocation32_spill]] %s4689_s8 }
   0xa   :  { %4729 = sst [smem:[#allocation33_spill]] %s4690_s9 }
   0xb   :  { %4730 = sst [smem:[#allocation34_spill]] %s4691_s10 }
   0xc   :  { %4731 = sst [smem:[#allocation35_spill]] %s4692_s11 }
   0xd   :  { %4732 = sst [smem:[#allocation36_spill]] %s4693_s12 }
   0xe   :  { %4733 = sst [smem:[#allocation37_spill]] %s4694_s13 }
   0xf   :  { %4734 = sst [smem:[#allocation38_spill]] %s4695_s14 }
  0x10   :  { %4735 = sst [smem:[#allocation39_spill]] %s4696_s15 }
  0x11   :  { %4736 = sst [smem:[#allocation40_spill]] %s4697_s16 }
  0x12   :  { %21 = vsyncpa [#allocation5], 0 }
  0x13   :  { %22 = vsyncpa [#allocation8], 0 }
  0x14   :  { %23 = vsyncpa [#allocation6], 0  ;;  %s3926_s21 = smov 0   ;;  %s3928_s22 = smov 0  }
  0x15   :  { %s3930_s23 = smov 0   ;;  %s3932_s24 = smov 0  }
  0x16   :  { %s3934_s25 = smov 0   ;;  %s3936_s26 = smov 0  }
  0x17 LB: > { %4737 = sst [smem:[#allocation20_spill]] %s3804_s23  ;;  %s3955_s27 = sadd.s32 4294967295, %s3816_s26   ;;  %s3816_s26 = sphi %s3936_s26, %s29_s26   ;;  %s3812_s25 = sphi %s3934_s25, %s4790_s25   ;;  %s3808_s24 = sphi %s3932_s24, %s4789_s24   ;;  %s3804_s23 = sphi %s3930_s23, %s4788_s23   ;;  %s3800_s22 = sphi %s3928_s22, %s4792_s22   ;;  %s3796_s21 = sphi %s3926_s21, %s4791_s21  }
  0x18   : > { %4738 = sst [smem:[#allocation21_spill]] %s3812_s25  ;;  %p102_p0 = scmp.ne.s32.totalorder %s3804_s23, %s3800_s22 }
  0x19   : > { %p103_p1 = scmp.eq.s32.totalorder %s3816_s26, 0  ;;  %p108_p2 = scmp.ne.s32.totalorder %s3800_s22, %s3796_s21 }
  0x1a   : > { %p4700_p3 = scmp.eq.s32.totalorder %s3955_s27, 0  ;;  %p2892_p5 = scmp.ge.s32.totalorder %s3816_s26, 1 }
  0x1b   : > { %p104_p4 = por %p103_p1, %p102_p0  ;;  %p473_p7 = scmp.lt.s32.totalorder %s3816_s26, 3 }
  0x1c   : > { %p3966_p6 = por %p4700_p3, %p108_p2  ;;  %s3818_s0 = smov [#allocation4]  }
  0x1d   : > { %p3971_p8 = pnand %p2892_p5, %p473_p7  ;;  %s488_s17 = sshll.u32 %s3818_s0, 4  ;;  %s489_s17 = int_to_ptr.vmem [resolvable:$true] %s488_s17 }
  0x1e   : > { %s4739_s29 = scalar_select %p3966_p6, 1, 0 }
  0x1f   : > { %s4740_s30 = scalar_select %p3971_p8, 1, 0 }
  0x20   : > { %p3260_p9 = pneg %p3971_p8  ;;  %p3288_p10 = scmp.lt.s32.totalorder %s3816_s26, 2 }
  0x21   : > { %s38_s20 = sadd.s32 1, %s3812_s25  ;;  %s4743_s16 = sld [smem:[#allocation24_spill]] }
  0x22   : > { %p3980_p11 = pnand %p3260_p9, %p4700_p3  ;;  %p3984_p12 = pnand %p3288_p10, %p104_p4 }
  0x24   : > { %s4741_s18 = scalar_select %p3980_p11, 1, 0 }
  0x25   : > { %s4742_s19 = scalar_select %p3984_p12, 1, 0 }
  0x26   : > { %p4708_p0 = pneg %p3980_p11 }
  0x27   : > { %s3492_s0 = scalar_lea.hbm %s4743_s16, 256 }
  0x28   : > { %p3493_p13 = scmp.ne.s32.totalorder %s4743_s16, %s3492_s0  ;;  %p3499_p4 = scmp.lt.u32.totalorder %s3492_s0, %s4743_s16 }
  0x2a   : > { %p3495_p1 = pnand %p4708_p0, %p3493_p13 }
  0x2c   : > { %p3496_p2 = pneg %p3495_p1 }
  0x2e   : > { %p3501_p5 = pnand %p3499_p4, %p3496_p2 }
  0x30   : > { %3504 = shalt.err (!%p3501_p5)
}
  0x31   : > { %s3505_s5 = scalar_lea.vmem %s489_s17, 256  ;;  %p3513_p3 = scmp.lt.s32.totalorder %s489_s17, %s489_s17 }
  0x32   : > { %p3506_p7 = scmp.ne.s32.totalorder %s489_s17, %s3505_s5  ;;  %p3514_p6 = scmp.lt.s32.totalorder %s3505_s5, %s3505_s5 }
  0x34   : > { %p3508_p9 = pnand %p3506_p7, %p4708_p0  ;;  %p3515_p8 = por %p3514_p6, %p3513_p3 }
  0x36   : > { %p3509_p10 = pneg %p3508_p9 }
  0x38   : > { %p3516_p12 = pnand %p3515_p8, %p3509_p10 }
  0x3a   : > { %3519 = shalt.err (!%p3516_p12)
}
  0x3b   : > { %s4704_s14 = smov 128   ;;  %s4705_s11 = smov 8  }
  0x3c   : > { %3263 = dma.hbm_to_vmem [thread:$0]  (!%p3980_p11), %s4743_s16, 256, %s489_s17, [#allocation5], %s4704_s14, %s4704_s14, %s4705_s11  }
  0x3d   : > { %p39_p3 = scmp.ge.s32.totalorder %s38_s20, 2  ;;  %s519_s5 = sand.u32 1, %s3816_s26  }
  0x3e   : > { %s4016_s28 = sand.u32 1, %s3804_s23   ;;  %s2896_s0 = sshll.u32 %s3812_s25, 4 }
  0x3f   : > { %s4794_s20 = smov (%p39_p3, %s38_s20), 0  ;;  %s4745_s2 = sld [smem:[#allocation26_spill]] }
  0x40   : > { %4744 = sst [smem:[#allocation22_spill]] %s4794_s20  ;;  %s92_s21 = ssub.s32 %s3812_s25, %s4794_s20 }
  0x41   : > { %p93_p6 = scmp.eq.s32.totalorder %s92_s21, 0  ;;  %s522_s17 = scalar_lea.vmem [#allocation9], %s4016_s28 }
  0x42   : > { %s529_s13 = sshll.u32 %s522_s17, 4  ;;  %s4746_s15 = sadd.s32 1, %s3804_s23  ;;  %s4034_s13 = int_to_ptr.vmem [resolvable:$true] %s529_s13 }
  0x43   : > { %s4032_s14 = scalar_select %p93_p6, %s3804_s23, %s4746_s15  }
  0x44   : > { %s4748_s3 = sld [smem:[#allocation27_spill]]  ;;  %s4041_s20 = scalar_lea.sflag [#allocation5], %s519_s5 }
  0x45   : > { %s4026_s7 = scalar_lea.hbm %s4745_s2, %s2896_s0  ;;  %4747 = sst [smem:[#allocation23_spill]] %s4032_s14 }
  0x46   : > { %s3520_s8 = scalar_lea.hbm %s4026_s7, 16  ;;  %p4749_p12 = scmp.ne.s32.totalorder %s4742_s19, 0 }
  0x47   : > { %p3521_p8 = scmp.ne.s32.totalorder %s4026_s7, %s3520_s8  ;;  %s3525_s14 = scalar_lea.hbm %s4745_s2, 32 }
  0x48   : > { %p4047_p13 = pneg %p4749_p12  ;;  %p3526_p4 = scmp.lt.u32.totalorder %s4026_s7, %s4745_s2 }
  0x49   : > { %p3527_p5 = scmp.lt.u32.totalorder %s3525_s14, %s3520_s8  ;;  %p3529_p9 = scmp.lt.u32.totalorder %s3520_s8, %s4026_s7 }
  0x4a   : > { %s4039_s21 = scalar_lea.hbm %s4748_s3, %s2896_s0  ;;  %p3523_p1 = pnand %p4047_p13, %p3521_p8 }
  0x4b   : > { %s4750_s9 = scalar_select %p4047_p13, 1, 0 }
  0x4c   : > { %p3524_p2 = pneg %p3523_p1  ;;  %p3528_p7 = por %p3527_p5, %p3526_p4 }
  0x4e   : > { %p3530_p10 = por %p3529_p9, %p3528_p7 }
  0x50   : > { %p3531_p3 = pnand %p3530_p10, %p3524_p2 }
  0x52   : > { %3534 = shalt.err (!%p3531_p3)
}
  0x53   : > { %s3535_s5 = scalar_lea.vmem %s4034_s13, 16  ;;  %s3821_s0 = smov [#allocation9]  }
  0x54   : > { %p3536_p6 = scmp.ne.s32.totalorder %s4034_s13, %s3535_s5  ;;  %s3540_s17 = sshll.u32 %s3821_s0, 4  ;;  %s3541_s17 = int_to_ptr.vmem [resolvable:$false] %s3540_s17 }
  0x55   : > { %s3542_s15 = scalar_lea.vmem %s3541_s17, 32  ;;  %p3543_p0 = scmp.lt.s32.totalorder %s4034_s13, %s3541_s17 }
  0x56   : > { %p3538_p8 = pnand %p3536_p6, %p4047_p13  ;;  %p3544_p11 = scmp.lt.s32.totalorder %s3542_s15, %s3535_s5 }
  0x58   : > { %p3539_p1 = pneg %p3538_p8  ;;  %p3545_p4 = por %p3544_p11, %p3543_p0 }
  0x5a   : > { %p3546_p5 = pnand %p3545_p4, %p3539_p1 }
  0x5c   : > { %3549 = shalt.err (!%p3546_p5)
}
  0x5d   : > { %3270 = dma.hbm_to_vmem [thread:$0]  (!%p4749_p12), %s4026_s7, 16, %s4034_s13, %s4041_s20  }
  0x5e   : > { %s539_s14 = scalar_lea.vmem [#allocation10], %s4016_s28  ;;  %s3232_s16 = smul.u32 192, %s4016_s28 }
  0x5f   : > { %s546_s8 = sshll.u32 %s539_s14, 4  ;;  %s3233_s11 = smul.u32 3072, %s3812_s25  ;;  %s547_s8 = int_to_ptr.vmem [resolvable:$true] %s546_s8 }
  0x60   : > { %s3550_s5 = scalar_lea.hbm %s4039_s21, 16  ;;  %s3555_s15 = scalar_lea.hbm %s4748_s3, 32 }
  0x61   : > { %p3551_p11 = scmp.ne.s32.totalorder %s4039_s21, %s3550_s5  ;;  %p3556_p7 = scmp.lt.u32.totalorder %s4039_s21, %s4748_s3 }
  0x62   : > { %p3557_p9 = scmp.lt.u32.totalorder %s3555_s15, %s3550_s5  ;;  %p3559_p3 = scmp.lt.u32.totalorder %s3550_s5, %s4039_s21 }
  0x63   : > { %p3553_p0 = pnand %p3551_p11, %p4047_p13 }
  0x64   : > { %p3558_p10 = por %p3557_p9, %p3556_p7 }
  0x65   : > { %p3554_p2 = pneg %p3553_p0 }
  0x66   : > { %p3560_p6 = por %p3559_p3, %p3558_p10 }
  0x68   : > { %p3561_p8 = pnand %p3560_p6, %p3554_p2 }
  0x6a   : > { %3564 = shalt.err (!%p3561_p8)
}
  0x6b   : > { %s3565_s7 = scalar_lea.vmem %s547_s8, 16  ;;  %s3822_s13 = smov [#allocation10]  }
  0x6c   : > { %p3566_p1 = scmp.ne.s32.totalorder %s547_s8, %s3565_s7  ;;  %s3570_s14 = sshll.u32 %s3822_s13, 4  ;;  %s3571_s14 = int_to_ptr.vmem [resolvable:$false] %s3570_s14 }
  0x6d   : > { %s3572_s0 = scalar_lea.vmem %s3571_s14, 32  ;;  %p3573_p11 = scmp.lt.s32.totalorder %s547_s8, %s3571_s14 }
  0x6e   : > { %p3568_p4 = pnand %p3566_p1, %p4047_p13  ;;  %p3574_p0 = scmp.lt.s32.totalorder %s3572_s0, %s3565_s7 }
  0x70   : > { %p3569_p5 = pneg %p3568_p4  ;;  %p3575_p12 = por %p3574_p0, %p3573_p11 }
  0x72   : > { %p3576_p7 = pnand %p3575_p12, %p3569_p5 }
  0x74   : > { %3579 = shalt.err (!%p3576_p7)
}
  0x75   : > { %p4751_p9 = scmp.ne.s32.totalorder %s4742_s19, 0  ;;  %s4752_s4 = sld [smem:[#allocation28_spill]] }
  0x76   : > { %s557_s17 = scalar_lea.vmem [#allocation11], %s3232_s16 }
  0x77   : > { %3273 = dma.hbm_to_vmem [thread:$0]  (!%p4751_p9), %s4039_s21, 16, %s547_s8, %s4041_s20  }
  0x78   : > { %s564_s15 = sshll.u32 %s557_s17, 4  ;;  %s4099_s15 = int_to_ptr.vmem [resolvable:$true] %s564_s15 }
  0x7b   : > { %s4095_s5 = scalar_lea.hbm %s4752_s4, %s3233_s11  ;;  %s3585_s13 = scalar_lea.hbm %s4752_s4, 6144 }
  0x7c   : > { %s3580_s7 = scalar_lea.hbm %s4095_s5, 3072  ;;  %p3586_p3 = scmp.lt.u32.totalorder %s4095_s5, %s4752_s4 }
  0x7d   : > { %p3581_p12 = scmp.ne.s32.totalorder %s4095_s5, %s3580_s7  ;;  %p3587_p6 = scmp.lt.u32.totalorder %s3585_s13, %s3580_s7 }
  0x7e   : > { %p3589_p1 = scmp.lt.u32.totalorder %s3580_s7, %s4095_s5 }
  0x7f   : > { %p3583_p2 = pnand %p3581_p12, %p4047_p13  ;;  %p3588_p8 = por %p3587_p6, %p3586_p3 }
  0x81   : > { %p3584_p10 = pneg %p3583_p2  ;;  %p3590_p4 = por %p3589_p1, %p3588_p8 }
  0x83   : > { %p3591_p5 = pnand %p3590_p4, %p3584_p10 }
  0x85   : > { %3594 = shalt.err (!%p3591_p5)
}
  0x86   : > { %s3595_s16 = scalar_lea.vmem %s4099_s15, 3072  ;;  %s3823_s0 = smov [#allocation11]  }
  0x87   : > { %p3596_p11 = scmp.ne.s32.totalorder %s4099_s15, %s3595_s16  ;;  %s3600_s2 = sshll.u32 %s3823_s0, 4  ;;  %s3601_s2 = int_to_ptr.vmem [resolvable:$false] %s3600_s2 }
  0x88   : > { %s3602_s23 = scalar_lea.vmem %s3601_s2, 6144  ;;  %p3603_p12 = scmp.lt.s32.totalorder %s4099_s15, %s3601_s2 }
  0x89   : > { %p3598_p0 = pnand %p3596_p11, %p4047_p13  ;;  %p3604_p2 = scmp.lt.s32.totalorder %s3602_s23, %s3595_s16 }
  0x8b   : > { %p3599_p7 = pneg %p3598_p0  ;;  %p3605_p3 = por %p3604_p2, %p3603_p12 }
  0x8d   : > { %p3606_p6 = pnand %p3605_p3, %p3599_p7 }
  0x8f   : > { %3609 = shalt.err (!%p3606_p6)
}
  0x90   : > { %s3824_s17 = smov 192   ;;  %s3825_s7 = smov 12  }
  0x91   : > { %3276 = dma.hbm_to_vmem [thread:$0]  (!%p4751_p9), %s4095_s5, 3072, %s4099_s15, %s4041_s20, %s3824_s17, %s3824_s17, %s3825_s7  }
  0x92   : > { %s2899_s21 = sshll.u32 %s4016_s28, 6  ;;  %s3015_s8 = sshll.u32 %s3812_s25, 10 }
  0x93   : > { %s4753_s6 = sld [smem:[#allocation30_spill]]  ;;  %s585_s16 = scalar_lea.vmem [#allocation12], %s2899_s21 }
  0x94   : > { %s592_s0 = sshll.u32 %s585_s16, 4  ;;  %s4130_s0 = int_to_ptr.vmem [resolvable:$true] %s592_s0 }
  0x99   : > { %s4128_s14 = scalar_lea.hbm %s4753_s6, %s3015_s8  ;;  %s3615_s23 = scalar_lea.hbm %s4753_s6, 2048 }
  0x9a   : > { %s3610_s2 = scalar_lea.hbm %s4128_s14, 1024  ;;  %p3616_p4 = scmp.lt.u32.totalorder %s4128_s14, %s4753_s6 }
  0x9b   : > { %p3611_p10 = scmp.ne.s32.totalorder %s4128_s14, %s3610_s2  ;;  %p3617_p5 = scmp.lt.u32.totalorder %s3615_s23, %s3610_s2 }
  0x9c   : > { %p3619_p0 = scmp.lt.u32.totalorder %s3610_s2, %s4128_s14 }
  0x9d   : > { %p3613_p8 = pnand %p3611_p10, %p4047_p13  ;;  %p3618_p11 = por %p3617_p5, %p3616_p4 }
  0x9f   : > { %p3614_p1 = pneg %p3613_p8  ;;  %p3620_p7 = por %p3619_p0, %p3618_p11 }
  0xa1   : > { %p3621_p12 = pnand %p3620_p7, %p3614_p1 }
  0xa3   : > { %3624 = shalt.err (!%p3621_p12)
}
  0xa4   : > { %s3625_s21 = scalar_lea.vmem %s4130_s0, 1024  ;;  %s3826_s8 = smov [#allocation12]  }
  0xa5   : > { %p3626_p2 = scmp.ne.s32.totalorder %s4130_s0, %s3625_s21  ;;  %s3630_s13 = sshll.u32 %s3826_s8, 4  ;;  %s3631_s13 = int_to_ptr.vmem [resolvable:$false] %s3630_s13 }
  0xa6   : > { %s3632_s11 = scalar_lea.vmem %s3631_s13, 2048  ;;  %p3633_p10 = scmp.lt.s32.totalorder %s4130_s0, %s3631_s13 }
  0xa7   : > { %p3628_p3 = pnand %p3626_p2, %p4047_p13  ;;  %p3634_p8 = scmp.lt.s32.totalorder %s3632_s11, %s3625_s21 }
  0xa9   : > { %p3629_p6 = pneg %p3628_p3  ;;  %p3635_p4 = por %p3634_p8, %p3633_p10 }
  0xab   : > { %p3636_p5 = pnand %p3635_p4, %p3629_p6 }
  0xad   : > { %3639 = shalt.err (!%p3636_p5)
}
  0xae   : > { %s4713_s16 = smov 64   ;;  %s4714_s2 = smov 4  }
  0xaf   : > { %3279 = dma.hbm_to_vmem [thread:$0]  (!%p4751_p9), %s4128_s14, 1024, %s4130_s0, %s4041_s20, %s4713_s16, %s4713_s16, %s4714_s2  }
  0xb0   : > { %s4715_s5 = sshll.u32 %s4016_s28, 7  ;;  %s3016_s15 = sshll.u32 %s3812_s25, 11 }
  0xb1   : > { %s4754_s10 = sld [smem:[#allocation34_spill]]  ;;  %s624_s21 = scalar_lea.vmem [#allocation13], %s4715_s5 }
  0xb2   : > { %s631_s8 = sshll.u32 %s624_s21, 4  ;;  %s3829_s13 = smov [#allocation7]   ;;  %s4168_s8 = int_to_ptr.vmem [resolvable:$true] %s631_s8 }
  0xb3   : > { %s4170_s11 = sshll.u32 %s3829_s13, 4  ;;  %s503_s11 = int_to_ptr.vmem [resolvable:$true] %s4170_s11 }
  0xb7   : > { %s4164_s7 = scalar_lea.hbm %s4754_s10, %s3016_s15  ;;  %s3645_s17 = scalar_lea.hbm %s4754_s10, 4096 }
  0xb8   : > { %s3640_s14 = scalar_lea.hbm %s4164_s7, 2048  ;;  %p3646_p7 = scmp.lt.u32.totalorder %s4164_s7, %s4754_s10 }
  0xb9   : > { %p3641_p1 = scmp.ne.s32.totalorder %s4164_s7, %s3640_s14  ;;  %p3647_p12 = scmp.lt.u32.totalorder %s3645_s17, %s3640_s14 }
  0xba   : > { %p3649_p3 = scmp.lt.u32.totalorder %s3640_s14, %s4164_s7 }
  0xbb   : > { %p3643_p11 = pnand %p3641_p1, %p4047_p13  ;;  %p3648_p2 = por %p3647_p12, %p3646_p7 }
  0xbd   : > { %p3644_p0 = pneg %p3643_p11  ;;  %p3650_p6 = por %p3649_p3, %p3648_p2 }
  0xbf   : > { %p3651_p10 = pnand %p3650_p6, %p3644_p0 }
  0xc1   : > { %3654 = shalt.err (!%p3651_p10)
}
  0xc2   : > { %s3655_s21 = scalar_lea.vmem %s4168_s8, 2048  ;;  %s3830_s13 = smov [#allocation13]  }
  0xc3   : > { %p3656_p8 = scmp.ne.s32.totalorder %s4168_s8, %s3655_s21  ;;  %s3660_s0 = sshll.u32 %s3830_s13, 4  ;;  %s3661_s0 = int_to_ptr.vmem [resolvable:$false] %s3660_s0 }
  0xc4   : > { %s3662_s16 = scalar_lea.vmem %s3661_s0, 4096  ;;  %p3663_p1 = scmp.lt.s32.totalorder %s4168_s8, %s3661_s0 }
  0xc5   : > { %p3658_p4 = pnand %p3656_p8, %p4047_p13  ;;  %p3664_p11 = scmp.lt.s32.totalorder %s3662_s16, %s3655_s21 }
  0xc7   : > { %p3659_p5 = pneg %p3658_p4  ;;  %p3665_p7 = por %p3664_p11, %p3663_p1 }
  0xc9   : > { %p3666_p12 = pnand %p3665_p7, %p3659_p5 }
  0xcb   : > { %3669 = shalt.err (!%p3666_p12)
}
  0xcc   : > { %s4755_s2 = smov 8   ;;  %s4756_s14 = smov 128  }
  0xcd   : > { %3282 = dma.hbm_to_vmem [thread:$0]  (!%p4751_p9), %s4164_s7, 2048, %s4168_s8, %s4041_s20, %s4756_s14, %s4756_s14, %s4755_s2  }
  0xce   : > { %s4757_s1 = sld [smem:[#allocation25_spill]]  ;;  %p4758_p2 = scmp.ne.s32.totalorder %s4741_s18, 0 }
  0xd0   : > { %p4759_p3 = pneg %p4758_p2 }
  0xd4   : > { %s3670_s13 = scalar_lea.hbm %s4757_s1, 128 }
  0xd5   : > { %p3671_p0 = scmp.ne.s32.totalorder %s4757_s1, %s3670_s13  ;;  %p3677_p8 = scmp.lt.u32.totalorder %s3670_s13, %s4757_s1 }
  0xd7   : > { %p3673_p6 = pnand %p3671_p0, %p4759_p3 }
  0xd9   : > { %p3674_p10 = pneg %p3673_p6 }
  0xdb   : > { %p3679_p4 = pnand %p3677_p8, %p3674_p10 }
  0xdd   : > { %3682 = shalt.err (!%p3679_p4)
}
  0xde   : > { %s3683_s7 = scalar_lea.vmem %s503_s11, 128  ;;  %p4760_p1 = pmov %p4759_p3 }
  0xdf   : > { %p3684_p5 = scmp.ne.s32.totalorder %s503_s11, %s3683_s7  ;;  %p3691_p12 = scmp.lt.s32.totalorder %s503_s11, %s503_s11 }
  0xe0   : > { %p3692_p9 = scmp.lt.s32.totalorder %s3683_s7, %s3683_s7 }
  0xe1   : > { %p3686_p11 = pnand %p3684_p5, %p4760_p1 }
  0xe2   : > { %p3693_p13 = por %p3692_p9, %p3691_p12 }
  0xe3   : > { %p3687_p7 = pneg %p3686_p11 }
  0xe5   : > { %p3694_p0 = pnand %p3693_p13, %p3687_p7 }
  0xe7   : > { %3697 = shalt.err (!%p3694_p0)
}
  0xe8   : > { %3266 = dma.hbm_to_vmem [thread:$0]  (!%p4758_p2), %s4757_s1, 128, %s503_s11, [#allocation8]  }
  0xe9   : > { %s4761_s12 = sld [smem:[#allocation36_spill]]  ;;  %s4762_s17 = sshll.u32 %s4016_s28, 7 }
  0xea   : > { %s652_s13 = scalar_lea.vmem [#allocation14], %s4762_s17  ;;  %p4763_p9 = scmp.ne.s32.totalorder %s4750_s9, 0 }
  0xeb   : > { %s659_s18 = sshll.u32 %s652_s13, 4  ;;  %s4227_s18 = int_to_ptr.vmem [resolvable:$true] %s659_s18 }
  0xef   : > { %s4223_s23 = scalar_lea.hbm %s4761_s12, %s3016_s15  ;;  %s3703_s16 = scalar_lea.hbm %s4761_s12, 4096 }
  0xf0   : > { %s3698_s21 = scalar_lea.hbm %s4223_s23, 2048  ;;  %p3704_p6 = scmp.lt.u32.totalorder %s4223_s23, %s4761_s12 }
  0xf1   : > { %p3699_p13 = scmp.ne.s32.totalorder %s4223_s23, %s3698_s21  ;;  %p3705_p10 = scmp.lt.u32.totalorder %s3703_s16, %s3698_s21 }
  0xf2   : > { %p3707_p4 = scmp.lt.u32.totalorder %s3698_s21, %s4223_s23 }
  0xf3   : > { %p3701_p3 = pnand %p3699_p13, %p4763_p9  ;;  %p3706_p8 = por %p3705_p10, %p3704_p6 }
  0xf5   : > { %p3702_p2 = pneg %p3701_p3  ;;  %p3708_p5 = por %p3707_p4, %p3706_p8 }
  0xf7   : > { %p3709_p1 = pnand %p3708_p5, %p3702_p2 }
  0xf9   : > { %3712 = shalt.err (!%p3709_p1)
}
  0xfa   : > { %s3713_s28 = scalar_lea.vmem %s4227_s18, 2048  ;;  %s3831_s8 = smov [#allocation14]  }
  0xfb   : > { %p3714_p11 = scmp.ne.s32.totalorder %s4227_s18, %s3713_s28  ;;  %s3718_s2 = sshll.u32 %s3831_s8, 4  ;;  %s3719_s2 = int_to_ptr.vmem [resolvable:$false] %s3718_s2 }
  0xfc   : > { %s3720_s5 = scalar_lea.vmem %s3719_s2, 4096  ;;  %p3721_p0 = scmp.lt.s32.totalorder %s4227_s18, %s3719_s2 }
  0xfd   : > { %p3716_p7 = pnand %p3714_p11, %p4763_p9  ;;  %p3722_p13 = scmp.lt.s32.totalorder %s3720_s5, %s3713_s28 }
  0xff   : > { %p3717_p12 = pneg %p3716_p7  ;;  %p3723_p3 = por %p3722_p13, %p3721_p0 }
 0x101   : > { %p3724_p6 = pnand %p3723_p3, %p3717_p12 }
 0x103   : > { %3727 = shalt.err (!%p3724_p6)
}
 0x104   : > { %p4764_p2 = scmp.ne.s32.totalorder %s4742_s19, 0  ;;  %s4765_s14 = smov 4  }
 0x105   : > { %s4766_s17 = smov 64   ;;  %p4767_p9 = scmp.ne.s32.totalorder %s4740_s30, 0 }
 0x106   : > { %3285 = dma.hbm_to_vmem [thread:$0]  (!%p4764_p2), %s4223_s23, 2048, %s4227_s18, %s4041_s20, %s4766_s17, %s4766_s17, %s4765_s14  }
 0x107   : > { %677 = sbr.rel (%p4767_p9) target bundleno = 4667 (0x123b), region = 84  ;;  %p4768_p10 = scmp.eq.s32.totalorder (!%p4767_p9), %s3955_s27, 0 }
 0x10e   : > { %3779 = dma.done.wait (%p4768_p10), [#allocation5], 256   ;;  %p4769_p8 = pmov %p4768_p10 }
 0x110   : > { %3781 = vsyncadd (%p4769_p8), [#allocation5], 4294967040  ;;  %p4770_p4 = pmov %p4769_p8 }
 0x112   : > { %3783 = dma.done.wait (%p4770_p4), [#allocation8], 128   ;;  %p4771_p5 = pmov %p4770_p4 }
 0x113   : > { %s687_s19 = sand.u32 1, %s3955_s27   ;;  %s4266_s20 = sand.u32 1, %s3800_s22  }
 0x114   : > { %3785 = vsyncadd (%p4771_p5), [#allocation8], 4294967168  ;;  %s688_s30 = scalar_lea.sflag [#allocation5], %s687_s19  ;;  %p4772_p1 = scmp.ne.s32.totalorder %s4739_s29, 0 }
 0x116   : > { %3787 = dma.done.wait (%p4772_p1), %s688_s30, 8224  }
 0x117   : > { %3789 = vsyncadd (%p4772_p1), %s688_s30, 4294959072  ;;  %s3234_s23 = smul.u32 192, %s4266_s20  ;;  %s2911_s13 = sshll.u32 %s4266_s20, 6 }
 0x118   : > { %s2912_s18 = sshll.u32 %s4266_s20, 7  ;;  %p822_p11 = scmp.lt.s32.totalorder %s3808_s24, 1 }
 0x119   : > { %s4773_s16 = sld [smem:[#allocation31_spill]]  ;;  %s4774_s8 = sld [smem:[#allocation32_spill]] }
 0x11a   : > { %s4278_s21 = scalar_select %p822_p11, %s3808_s24, 1 }
 0x11b   : > { %s4775_s17 = sld [smem:[#allocation33_spill]]  ;;  %s4776_s1 = sld [smem:[#allocation29_spill]] }
 0x11c   : > { %s3235_s29 = smul.u32 3, %s4278_s21  ;;  %s2914_s4 = sshll.u32 %s4278_s21, 1 }
 0x11d   : > { %s4777_s12 = sld [smem:[#allocation35_spill]]  ;;  %s698_s28 = scalar_lea.vmem [#allocation10], %s4266_s20 }
 0x11e   : > { %s4311_s5 = scalar_lea.vmem [#allocation12], %s2911_s13  ;;  %s4313_s14 = scalar_lea.vmem [#allocation13], %s2912_s18 }
 0x11f   : > { %s828_s15 = scalar_lea.vmem %s4773_s16, %s4278_s21  ;;  %s831_s2 = scalar_lea.vmem %s4774_s8, %s4278_s21 }
 0x120   : > { %s4778_s16 = sld [smem:[#allocation37_spill]]  ;;  %s4309_s8 = scalar_lea.vmem [#allocation11], %s3234_s23 }
 0x121   : > { %s834_s19 = scalar_lea.vmem %s4775_s17, %s4278_s21  ;;  %s4296_s3 = scalar_lea.vmem %s4776_s1, %s3235_s29 }
 0x122   : > { %s4315_s9 = scalar_lea.vmem [#allocation14], %s2912_s18  ;;  %p2915_p7 = scmp.ne.s32.totalorder %s3808_s24, 0 }
 0x123   : > { %s4302_s25 = scalar_lea.vmem %s4777_s12, %s2914_s4  ;;  %v848_v0 = vld [vmem:[#allocation4] sm:$0xff] (!%p2915_p7)  ;;  %v850_v1 = vld [vmem:[#allocation7] sm:$0xff] (!%p2915_p7)  ;;  %v849_v2 = vld [vmem:[#allocation4 + $0x8] sm:$0xff] (!%p2915_p7) }
 0x124   : > { %847 = sbr.rel (%p2915_p7) target bundleno = 299 (0x12b), region = 120  ;;  %v851_v3 = vadd.f32 (!%p2915_p7), %v850_v1, %v848_v0  ;;  %v852_v4 = vadd.f32 (!%p2915_p7), %v850_v1, %v849_v2 }
 0x126   : > { %s841_s7 = scalar_lea.vmem %s4778_s16, %s4278_s21  ;;  %853 = vst [vmem:[#allocation2] sm:$0xff] (!%p2915_p7), %v851_v3  ;;  %854 = vst [vmem:[#allocation2 + $0x8] sm:$0xff] (!%p2915_p7), %v852_v4 }
 0x12b PF: > { %v3358_v7 = vld [vmem:[%s4309_s8 + $0x4] ss:$12 sps:$4 sm:$0xff]   ;;  %v3360_v8 = vld [vmem:[%s4309_s8] ss:$12 sps:$4 sm:$0xff]   ;;  %v3832_v9 = vmov 0.0   ;;  %v3833_v35 = vmov 0   ;;  %v933_v58 = vlaneseq }
 0x12c   : > { %3096 = vmatprep.subr.bf16.mxu1 %v3832_v9  ;;  %v3361_v10 = vld [vmem:[%s4309_s8 + $0x8] ss:$12 sps:$4 sm:$0xff]   ;;  %1076 = vmatprep.subr.bf16.mxu0 %v3358_v7  ;;  %v3364_v20 = vld [vmem:[%s4309_s8 + $0x18] ss:$12 sps:$4 sm:$0xff]   ;;  %v3365_v21 = vld [vmem:[%s4309_s8 + $0x20] ss:$12 sps:$4 sm:$0xff]  }
 0x12d   : > { %v855_v5 = vld [vmem:[#allocation2] sm:$0xff]  ;;  %v856_v6 = vld [vmem:[#allocation2 + $0x8] sm:$0xff]  ;;  %1077 = vmatpush1.bf16.msra.mxu0 %v3360_v8  ;;  %3097 = vmatpush3.bf16.msra.mxu1 %v3361_v10  ;;  %v3366_v22 = vld [vmem:[%s4309_s8 + $0x34] ss:$12 sps:$4 sm:$0xff]   ;;  %vm3834_vm0 = vmmov 0   ;;  %s4779_s1 = scalar_lea.vmem [#allocation9], %s4266_s20 }
 0x12e   : > { %859 = vadd.xlane.f32.xlu0 %v855_v5  ;;  %v3362_v11 = vld [vmem:[%s4309_s8 + $0x1c] ss:$12 sps:$4 sm:$0xff]   ;;  %3098 = vmatprep.subr.bf16.mxu1 %v3832_v9  ;;  %v3369_v24 = vld [vmem:[%s4309_s8 + $0x38] ss:$12 sps:$4 sm:$0xff]   ;;  %v3376_v29 = vld [vmem:[%s4309_s8 + $0x60] ss:$12 sps:$4 sm:$0xff]  }
 0x12f   : > { %1078 = vmatprep.subr.bf16.mxu0 %v3362_v11  ;;  %v3368_v23 = vld [vmem:[%s4309_s8 + $0x30] ss:$12 sps:$4 sm:$0xff]   ;;  %v3370_v25 = vld [vmem:[%s4309_s8 + $0x4c] ss:$12 sps:$4 sm:$0xff]   ;;  %v3372_v26 = vld [vmem:[%s4309_s8 + $0x48] ss:$12 sps:$4 sm:$0xff]   ;;  %1108 = vmatprep.mubr.bf16.mxu0 %v3833_v35 }
 0x130   : > { %v3373_v27 = vld [vmem:[%s4309_s8 + $0x50] ss:$12 sps:$4 sm:$0xff]   ;;  %v3377_v30 = vld [vmem:[%s4309_s8 + $0x68] ss:$12 sps:$4 sm:$0xff]   ;;  %v3380_v32 = vld [vmem:[%s4309_s8 + $0x78] ss:$12 sps:$4 sm:$0xff]   ;;  %3112 = vmatprep.mubr.msk.bf16.mxu1 %vm3834_vm0, %v3832_v9 }
 0x131   : > { %1079 = vmatpush1.bf16.msra.mxu0 %v3364_v20  ;;  %3099 = vmatpush3.bf16.msra.mxu1 %v3365_v21  ;;  %v3374_v28 = vld [vmem:[%s4309_s8 + $0x64] ss:$12 sps:$4 sm:$0xff]   ;;  %v3378_v31 = vld [vmem:[%s4309_s8 + $0x7c] ss:$12 sps:$4 sm:$0xff]   ;;  %v3381_v33 = vld [vmem:[%s4309_s8 + $0x80] ss:$12 sps:$4 sm:$0xff]  }
 0x132   : > { %861 = vadd.xlane.f32.xlu0 %v856_v6  ;;  %3100 = vmatprep.subr.bf16.mxu1 %v3832_v9  ;;  %v3382_v34 = vld [vmem:[%s4309_s8 + $0x94] ss:$12 sps:$4 sm:$0xff]   ;;  %v3384_v36 = vld [vmem:[%s4309_s8 + $0x90] ss:$12 sps:$4 sm:$0xff]   ;;  %v3385_v37 = vld [vmem:[%s4309_s8 + $0x98] ss:$12 sps:$4 sm:$0xff]  }
 0x133   : > { %1080 = vmatprep.subr.bf16.mxu0 %v3366_v22  ;;  %v3386_v38 = vld [vmem:[%s4309_s8 + $0xac] ss:$12 sps:$4 sm:$0xff]   ;;  %v3388_v39 = vld [vmem:[%s4309_s8 + $0xa8] ss:$12 sps:$4 sm:$0xff]   ;;  %v3389_v40 = vld [vmem:[%s4309_s8 + $0xb0] ss:$12 sps:$4 sm:$0xff]  }
 0x134   : > { %v2916_v49 = vld [vmem:[%s4779_s1] ss:$0 sm:$0xff]  ;;  %v4373_v59 = vshrl.u32 %v933_v58, 7  ;;  %vm1180_vm1 = vcmask 261120   ;;  %vm1301_vm2 = vcmask 1043456   ;;  %vm1273_vm3 = vcmask 64512  }
 0x135   : > { %1081 = vmatpush1.bf16.msra.mxu0 %v3368_v23  ;;  %3101 = vmatpush3.bf16.msra.mxu1 %v3369_v24  ;;  %v2917_v53 = vld [vmem:[%s698_s28] ss:$0 sm:$0xff]  ;;  %s3836_s4 = smov 64   ;;  %s3837_s6 = smov 32   ;;  %vm1621_vm4 = vcmask 523520   ;;  %vm1852_vm5 = vcmask 785920  }
 0x136   : > { %3102 = vmatprep.subr.bf16.mxu1 %v3832_v9  ;;  %1082 = vmatprep.subr.bf16.mxu0 %v3370_v25  ;;  %v939_v60 = vsub.s32 1, %v4373_v59  ;;  %v931_v61 = vld [vmem:[%s4296_s3] sm:$0x7]  ;;  %v935_v62 = vsub.s32 0, %v4373_v59  ;;  %v943_v63 = vsub.s32 2, %v4373_v59  ;;  %s3835_s3 = smov 96  }
 0x137   : > { %vm2083_vm6 = vcmask 1048320   ;;  %p3008_p12 = scmp.ne.s32.totalorder %s3808_s24, 1 }
 0x138   : > { %v940_v0 = vrot.slane %v931_v61, %v939_v60  ;;  %v936_v1 = vrot.slane %v931_v61, %v935_v62  ;;  %v944_v4 = vrot.slane %v931_v61, %v943_v63  ;;  %s4784_s30 = sld [smem:[#allocation38_spill]] (!%p3008_p12)  ;;  %s4785_s16 = sld [smem:[#allocation39_spill]] (!%p3008_p12) }
 0x139   : > { %1083 = vmatpush1.bf16.msra.mxu0 %v3372_v26  ;;  %3103 = vmatpush3.bf16.msra.mxu1 %v3373_v27 }
 0x13a   : > { %3104 = vmatprep.subr.bf16.mxu1 %v3832_v9  ;;  %1084 = vmatprep.subr.bf16.mxu0 %v3374_v28 }
 0x13d   : > { %1085 = vmatpush1.bf16.msra.mxu0 %v3376_v29  ;;  %3105 = vmatpush3.bf16.msra.mxu1 %v3377_v30 }
 0x13e   : > { %1086 = vmatprep.subr.bf16.mxu0 %v3378_v31  ;;  %3106 = vmatprep.subr.bf16.mxu1 %v3832_v9 }
 0x141   : > { %1087 = vmatpush1.bf16.msra.mxu0 %v3380_v32  ;;  %3107 = vmatpush3.bf16.msra.mxu1 %v3381_v33 }
 0x142   : > { %1088 = vmatprep.subr.bf16.mxu0 %v3382_v34  ;;  %3108 = vmatprep.subr.bf16.mxu1 %v3832_v9 }
 0x145   : > { %1089 = vmatpush1.bf16.msra.mxu0 %v3384_v36  ;;  %3109 = vmatpush3.bf16.msra.mxu1 %v3385_v37 }
 0x146   : > { %1090 = vmatprep.subr.bf16.mxu0 %v3386_v38  ;;  %3110 = vmatprep.subr.bf16.mxu1 %v3832_v9 }
 0x149   : > { %1091 = vmatpush1.bf16.msra.mxu0 %v3388_v39  ;;  %3111 = vmatpush3.bf16.msra.mxu1 %v3389_v40 }
 0x14a   : > { %3116 = vmatprep.subr.bf16.mxu1 %v3832_v9  ;;  %3140 = vmatprep.subr.bf16.mxu0 %v3832_v9 }
 0x1bb   : > { %v860_v12 = vpop.xlane.xlu0 %859 }
 0x1bc   : > { %v864_v13 = vmul.f32 0.0078125, %v860_v12 }
 0x1be   : > { %v4324_v14 = vsub.f32 %v855_v5, %v864_v13 }
 0x1bf   : > { %v862_v15 = vpop.xlane.xlu0 %861 }
 0x1c0   : > { %v865_v16 = vmul.f32 0.0078125, %v862_v15  ;;  %v868_v17 = vmul.f32 %v4324_v14, %v4324_v14 }
 0x1c2   : > { %v4328_v18 = vsub.f32 %v856_v6, %v865_v16  ;;  %870 = vadd.xlane.f32.xlu1 %v868_v17 }
 0x1c4   : > { %v869_v19 = vmul.f32 %v4328_v18, %v4328_v18 }
 0x1c6   : > { %872 = vadd.xlane.f32.xlu1 %v869_v19 }
 0x24f   : > { %v871_v41 = vpop.xlane.xlu1 %870 }
 0x250   : > { %v874_v42 = vmul.f32 0.0078125, %v871_v41 }
 0x252   : > { %v876_v43 = vadd.f32 1e-05, %v874_v42 }
 0x253   : > { %v873_v44 = vpop.xlane.xlu1 %872 }
 0x254   : > { %3438 = vrsqrt.f32 %v876_v43  ;;  %v875_v45 = vmul.f32 0.0078125, %v873_v44 }
 0x256   : > { %v877_v46 = vadd.f32 1e-05, %v875_v45 }
 0x258   : > { %3440 = vrsqrt.f32 %v877_v46 }
 0x25e   : > { %v3439_v47 = vpop.eup %3438 }
 0x25f   : > { %v880_v48 = vmul.f32 %v3439_v47, %v4324_v14 }
 0x261   : > { %v888_v52 = vmul.f32 %v2916_v49, %v880_v48 }
 0x262   : > { %v3441_v50 = vpop.eup %3440 }
 0x263   : > { %v881_v51 = vmul.f32 %v3441_v50, %v4328_v18  ;;  %v896_v55 = vadd.f32 %v2917_v53, %v888_v52 }
 0x265   : > { %v889_v54 = vmul.f32 %v2916_v49, %v881_v51 }
 0x267   : > { %v897_v56 = vadd.f32 %v2917_v53, %v889_v54 }
 0x269   : > { %v898_v57 = vpack.c.bf16 %v897_v56, %v896_v55 }
 0x26b   : > { %1109 = vmatmul.mubr.bf16.vlgmr.msra.gmra.mrb[0].mxu0 %v898_v57  ;;  %3113 = vmatmul.mubr.bf16.vlgmr.msra.gmra.mrb[0].mxu1 %v898_v57 }
 0x26c   : > { %3118 = vmatprep.mubr.msk.bf16.mxu1 %vm3834_vm0, %v3832_v9  ;;  %3142 = vmatprep.mubr.msk.bf16.mxu0 %vm3834_vm0, %v3832_v9 }
 0x33e   : > { %v1110_v2 = vpop.f32.mrb[0].mxu0  ;;  %v1153_v3 = vpop.f32.mrb[0].mxu1 }
 0x33f   : > { %v1112_v5 = vpop.f32.mrb[1].mxu0  ;;  %v3114_v6 = vpop.f32.mrb[1].mxu1  ;;  %v1111_v14 = vadd.f32 %v1110_v2, %v936_v1  ;;  %v1154_v22 = vadd.f32 %v1153_v3, %v944_v4 }
 0x340   : > { %v1113_v7 = vadd.f32 %v1112_v5, %v940_v0  ;;  %v1114_v8 = vpop.f32.mrb[2].mxu0  ;;  %v1156_v10 = vpop.f32.mrb[2].mxu1 }
 0x341   : > { %v4383_v11 = vadd.f32 %v1156_v10, %v944_v4  ;;  %v1116_v12 = vpop.f32.mrb[3].mxu0  ;;  %v3115_v13 = vpop.f32.mrb[3].mxu1  ;;  %v1160_v18 = vmul.f32 0.17677669, %v1111_v14  ;;  %v1115_v21 = vadd.f32 %v1114_v8, %v936_v1  ;;  %v4401_v25 = vpack.c.bf16 %v1154_v22, %v1154_v22 }
 0x342   : > { %v4385_v15 = vpack.c.bf16 %v1113_v7, %v1113_v7  ;;  %v1117_v16 = vadd.f32 %v1116_v12, %v940_v0 }
 0x343   : > { %v4392_v20 = vpack.c.bf16 %v1160_v18, %v1160_v18  ;;  %v1161_v24 = vmul.f32 0.17677669, %v1115_v21  ;;  %v1303_v27 = vsel %vm1301_vm2, %v4401_v25, 0  ;;  %v4428_v55 = vpack.c.bf16 %v4383_v11, %v4383_v11 }
 0x344   : > { %v1185_v17 = vsel %vm1180_vm1, %v4385_v15, 0  ;;  %v4390_v19 = vpack.c.bf16 %v1117_v16, %v1117_v16 }
 0x345   : > { %3117 = vmatpush3.bf16.xpose.msra.mxu1 %v1185_v17  ;;  %v4403_v26 = vpack.c.bf16 %v1161_v24, %v1161_v24  ;;  %v1349_v61 = vsel %vm1301_vm2, %v4428_v55, 0 }
 0x346   : > { %3122 = vmatprep.subr.bf16.mxu1 %v3832_v9  ;;  %v1231_v23 = vsel %vm1180_vm1, %v4390_v19, 0 }
 0x34c   : > { %3119 = vmatmul.mubr.msk.bf16.vlgmr.msra.gmra.mrb[4].mxu1 %vm1180_vm1, %v4392_v20 }
 0x34d   : > { %3123 = vmatpush3.bf16.xpose.msra.mxu1 %v1231_v23  ;;  %3124 = vmatprep.mubr.msk.bf16.mxu1 %vm3834_vm0, %v3832_v9 }
 0x34e   : > { %3128 = vmatprep.subr.bf16.mxu1 %v3832_v9 }
 0x354   : > { %3125 = vmatmul.mubr.msk.bf16.vlgmr.msra.gmra.mrb[8].mxu1 %vm1180_vm1, %v4403_v26 }
 0x355   : > { %3129 = vmatpush3.bf16.msra.mxu1 %v1303_v27  ;;  %3130 = vmatprep.mubr.msk.bf16.mxu1 %vm3834_vm0, %v3832_v9 }
 0x356   : > { %3134 = vmatprep.subr.bf16.mxu1 %v3832_v9 }
 0x41f   : > { %v1221_v28 = vpop.f32.mrb[4].mxu1 }
 0x420   : > { %v3120_v29 = vpop.f32.mrb[5].mxu1  ;;  %v1274_v30 = vsel %vm1273_vm3, %v1221_v28, -inf }
 0x421   : > { %1275 = vmax.xlane.f32.xlu0 %v1274_v30  ;;  %v1224_v31 = vpop.f32.mrb[6].mxu1 }
 0x422   : > { %v3121_v32 = vpop.f32.mrb[7].mxu1 }
 0x427   : > { %v1267_v33 = vpop.f32.mrb[8].mxu1 }
 0x428   : > { %v3126_v34 = vpop.f32.mrb[9].mxu1  ;;  %v1277_v36 = vsel %vm1273_vm3, %v1267_v33, -inf }
 0x429   : > { %1278 = vmax.xlane.f32.xlu1 %v1277_v36  ;;  %v1270_v37 = vpop.f32.mrb[10].mxu1 }
 0x42a   : > { %v3127_v38 = vpop.f32.mrb[11].mxu1 }
 0x43a   : > { %1445 = vrot.lane.b32.xlu1 %v4390_v19, %s3835_s3 }
 0x4ae   : > { %v1276_v39 = vpop.xlane.xlu0 %1275 }
 0x4af   : > { %v1280_v40 = vsub.f32 %v1221_v28, %v1276_v39 }
 0x4b1   : > { %v1282_v41 = vmul.f32 1.442695, %v1280_v40 }
 0x4b3   : > { %3442 = vpow2.f32 %v1282_v41 }
 0x4b6   : > { %v1279_v42 = vpop.xlane.xlu1 %1278 }
 0x4b7   : > { %v1281_v43 = vsub.f32 %v1267_v33, %v1279_v42 }
 0x4b9   : > { %v1284_v44 = vmul.f32 1.442695, %v1281_v43 }
 0x4ba   : > { %v1446_v50 = vpop.permute.xlu1 %1445 }
 0x4bb   : > { %3444 = vpow2.f32 %v1284_v44  ;;  %v1451_v2 = vsel %vm1180_vm1, %v1446_v50, 0 }
 0x4bd   : > { %v3443_v45 = vpop.eup %3442 }
 0x4be   : > { %v1286_v46 = vsel %vm1273_vm3, %v3443_v45, 0.0 }
 0x4bf   : > { %1287 = vadd.xlane.f32.xlu0 %v1286_v46 }
 0x4c5   : > { %v3445_v47 = vpop.eup %3444 }
 0x4c6   : > { %v1289_v48 = vsel %vm1273_vm3, %v3445_v47, 0.0 }
 0x4c7   : > { %1290 = vadd.xlane.f32.xlu1 %v1289_v48 }
 0x4d5   : > { %1395 = vrot.lane.b32.xlu0 %v4385_v15, %s3835_s3 }
 0x4d8   : > { %1393 = vrot.lane.b32.xlu1 %v4392_v20, %s3835_s3 }
 0x4dc   : > { %1443 = vrot.lane.b32.xlu1 %v4403_v26, %s3835_s3 }
 0x54c   : > { %v1288_v49 = vpop.xlane.xlu0 %1287 }
 0x54d   : > { %3446 = vrcp.f32 %v1288_v49 }
 0x550   : > { %v1396_v51 = vpop.permute.xlu0 %1395 }
 0x551   : > { %v1401_v52 = vsel %vm1180_vm1, %v1396_v51, 0 }
 0x552   : > { %3141 = vmatpush3.bf16.xpose.msra.mxu0 %v1401_v52 }
 0x553   : > { %3152 = vmatprep.subr.bf16.mxu0 %v3832_v9 }
 0x554   : > { %v1291_v53 = vpop.xlane.xlu1 %1290 }
 0x555   : > { %3448 = vrcp.f32 %v1291_v53 }
 0x557   : > { %v3447_v54 = vpop.eup %3446 }
 0x558   : > { %v1294_v56 = vmul.f32 %v3447_v54, %v3443_v45  ;;  %v1394_v57 = vpop.permute.xlu1 %1393 }
 0x559   : > { %3143 = vmatmul.mubr.msk.bf16.vlgmr.msra.gmra.mrb[4].mxu0 %vm1180_vm1, %v1394_v57 }
 0x55a   : > { %v1296_v58 = vpack.c.bf16 %v1294_v56, %v1294_v56  ;;  %3154 = vmatprep.mubr.msk.bf16.mxu0 %vm3834_vm0, %v3832_v9 }
 0x55c   : > { %3131 = vmatmul.mubr.msk.bf16.vlgmr.msra.gmra.mrb[12].mxu1 %vm1273_vm3, %v1296_v58  ;;  %v1444_v3 = vpop.permute.xlu1 %1443 }
 0x55d   : > { %3135 = vmatpush3.bf16.msra.mxu1 %v1349_v61  ;;  %3136 = vmatprep.mubr.msk.bf16.mxu1 %vm3834_vm0, %v3832_v9 }
 0x55e   : > { %3146 = vmatprep.subr.bf16.mxu1 %v3832_v9 }
 0x55f   : > { %v3449_v63 = vpop.eup %3448 }
 0x560   : > { %v1295_v0 = vmul.f32 %v3449_v63, %v3445_v47 }
 0x562   : > { %v1297_v1 = vpack.c.bf16 %v1295_v0, %v1295_v0 }
 0x564   : > { %3137 = vmatmul.mubr.msk.bf16.vlgmr.msra.gmra.mrb[16].mxu1 %vm1273_vm3, %v1297_v1 }
 0x565   : > { %3148 = vmatprep.mubr.msk.bf16.mxu1 %vm3834_vm0, %v3832_v9 }
 0x566   : > { %3147 = vmatpush3.bf16.xpose.msra.mxu1 %v1451_v2 }
 0x567   : > { %3158 = vmatprep.subr.bf16.mxu1 %v3832_v9 }
 0x56d   : > { %3149 = vmatmul.mubr.msk.bf16.vlgmr.msra.gmra.mrb[20].mxu1 %vm1180_vm1, %v1444_v3 }
 0x56e   : > { %3160 = vmatprep.mubr.msk.bf16.mxu1 %vm3834_vm0, %v3832_v9 }
 0x62c   : > { %v1437_v4 = vpop.f32.mrb[4].mxu0 }
 0x62d   : > { %v3144_v5 = vpop.f32.mrb[5].mxu0  ;;  %v1493_v6 = vsel %vm1273_vm3, %v1437_v4, -inf }
 0x62e   : > { %1494 = vmax.xlane.f32.xlu0 %v1493_v6  ;;  %v1440_v7 = vpop.f32.mrb[6].mxu0 }
 0x62f   : > { %v1339_v8 = vpop.f32.mrb[12].mxu1  ;;  %v3145_v10 = vpop.f32.mrb[7].mxu0 }
 0x630   : > { %1391 = vst.msk [vmem:[#allocation3] sm:$0xff] %vm1180_vm1, %v1339_v8  ;;  %v3132_v11 = vpop.f32.mrb[13].mxu1 }
 0x631   : > { %v1342_v12 = vpop.f32.mrb[14].mxu1 }
 0x632   : > { %v3133_v13 = vpop.f32.mrb[15].mxu1 }
 0x637   : > { %v1385_v14 = vpop.f32.mrb[16].mxu1 }
 0x638   : > { %1392 = vst.msk [vmem:[#allocation3 + $0x8] sm:$0xff] %vm1180_vm1, %v1385_v14  ;;  %v3138_v16 = vpop.f32.mrb[17].mxu1 }
 0x639   : > { %v1388_v17 = vpop.f32.mrb[18].mxu1 }
 0x63a   : > { %v3139_v18 = vpop.f32.mrb[19].mxu1 }
 0x640   : > { %v1487_v21 = vpop.f32.mrb[20].mxu1 }
 0x641   : > { %v3150_v22 = vpop.f32.mrb[21].mxu1  ;;  %v1496_v23 = vsel %vm1273_vm3, %v1487_v21, -inf }
 0x642   : > { %1497 = vmax.xlane.f32.xlu1 %v1496_v23  ;;  %v1490_v24 = vpop.f32.mrb[22].mxu1 }
 0x643   : > { %v3151_v27 = vpop.f32.mrb[23].mxu1 }
 0x653   : > { %1565 = vrot.lane.b32.xlu1 %v4428_v55, %s3835_s3 }
 0x657   : > { %1626 = vrot.lane.b32.xlu1 %v4385_v15, %s3836_s4 }
 0x65b   : > { %1676 = vrot.lane.b32.xlu1 %v4390_v19, %s3836_s4 }
 0x65f   : > { %1674 = vrot.lane.b32.xlu1 %v4403_v26, %s3836_s4 }
 0x6bb   : > { %v1495_v28 = vpop.xlane.xlu0 %1494 }
 0x6bc   : > { %v1499_v29 = vsub.f32 %v1437_v4, %v1495_v28 }
 0x6be   : > { %v1501_v30 = vmul.f32 1.442695, %v1499_v29 }
 0x6c0   : > { %3450 = vpow2.f32 %v1501_v30 }
 0x6ca   : > { %v3451_v31 = vpop.eup %3450 }
 0x6cb   : > { %v1505_v32 = vsel %vm1273_vm3, %v3451_v31, 0.0 }
 0x6cc   : > { %1506 = vadd.xlane.f32.xlu0 %v1505_v32 }
 0x6cf   : > { %v1498_v33 = vpop.xlane.xlu1 %1497 }
 0x6d0   : > { %v1500_v34 = vsub.f32 %v1487_v21, %v1498_v33 }
 0x6d2   : > { %v1503_v36 = vmul.f32 1.442695, %v1500_v34 }
 0x6d3   : > { %v1566_v37 = vpop.permute.xlu1 %1565 }
 0x6d4   : > { %3452 = vpow2.f32 %v1503_v36  ;;  %v1571_v38 = vsel %vm1301_vm2, %v1566_v37, 0 }
 0x6d5   : > { %3159 = vmatpush3.bf16.msra.mxu1 %v1571_v38 }
 0x6d6   : > { %3170 = vmatprep.subr.bf16.mxu1 %v3832_v9 }
 0x6d7   : > { %v1627_v47 = vpop.permute.xlu1 %1626 }
 0x6d8   : > { %v1632_v52 = vsel %vm1180_vm1, %v1627_v47, 0 }
 0x6db   : > { %v1677_v51 = vpop.permute.xlu1 %1676 }
 0x6dc   : > { %v1682_v54 = vsel %vm1180_vm1, %v1677_v51, 0 }
 0x6de   : > { %v3453_v39 = vpop.eup %3452 }
 0x6df   : > { %v1508_v40 = vsel %vm1273_vm3, %v3453_v39, 0.0  ;;  %v1675_v57 = vpop.permute.xlu1 %1674 }
 0x6e0   : > { %1509 = vadd.xlane.f32.xlu0 %v1508_v40 }
 0x6f6   : > { %1517 = vrot.lane.b32.xlu0 %v4401_v25, %s3835_s3 }
 0x6fa   : > { %1624 = vrot.lane.b32.xlu0 %v4392_v20, %s3836_s4 }
 0x759   : > { %v1507_v41 = vpop.xlane.xlu0 %1506 }
 0x75a   : > { %3454 = vrcp.f32 %v1507_v41 }
 0x764   : > { %v3455_v42 = vpop.eup %3454 }
 0x765   : > { %v1513_v44 = vmul.f32 %v3455_v42, %v3451_v31 }
 0x767   : > { %v1515_v48 = vpack.c.bf16 %v1513_v44, %v1513_v44 }
 0x76d   : > { %v1510_v43 = vpop.xlane.xlu0 %1509 }
 0x76e   : > { %3456 = vrcp.f32 %v1510_v43 }
 0x771   : > { %v1518_v45 = vpop.permute.xlu0 %1517 }
 0x772   : > { %v1523_v46 = vsel %vm1301_vm2, %v1518_v45, 0 }
 0x773   : > { %3153 = vmatpush3.bf16.msra.mxu0 %v1523_v46 }
 0x774   : > { %3164 = vmatprep.subr.bf16.mxu0 %v3832_v9 }
 0x775   : > { %v1625_v56 = vpop.permute.xlu0 %1624 }
 0x776   : > { %3155 = vmatmul.mubr.msk.bf16.vlgmr.msra.gmra.mrb[8].mxu0 %vm1273_vm3, %v1515_v48 }
 0x777   : > { %3166 = vmatprep.mubr.msk.bf16.mxu0 %vm3834_vm0, %v3832_v9 }
 0x778   : > { %v3457_v49 = vpop.eup %3456 }
 0x779   : > { %v1514_v50 = vmul.f32 %v3457_v49, %v3453_v39 }
 0x77b   : > { %v1516_v53 = vpack.c.bf16 %v1514_v50, %v1514_v50 }
 0x77c   : > { %3165 = vmatpush3.bf16.xpose.msra.mxu0 %v1632_v52 }
 0x77d   : > { %3161 = vmatmul.mubr.msk.bf16.vlgmr.msra.gmra.mrb[24].mxu1 %vm1273_vm3, %v1516_v53  ;;  %3176 = vmatprep.subr.bf16.mxu0 %v3832_v9 }
 0x77e   : > { %3171 = vmatpush3.bf16.xpose.msra.mxu1 %v1682_v54  ;;  %3172 = vmatprep.mubr.msk.bf16.mxu1 %vm3834_vm0, %v3832_v9 }
 0x77f   : > { %3182 = vmatprep.subr.bf16.mxu1 %v3832_v9 }
 0x783   : > { %3167 = vmatmul.mubr.msk.bf16.vlgmr.msra.gmra.mrb[12].mxu0 %vm1180_vm1, %v1625_v56 }
 0x784   : > { %3178 = vmatprep.mubr.msk.bf16.mxu0 %vm3834_vm0, %v3832_v9 }
 0x785   : > { %3173 = vmatmul.mubr.msk.bf16.vlgmr.msra.gmra.mrb[28].mxu1 %vm1180_vm1, %v1675_v57 }
 0x786   : > { %3184 = vmatprep.mubr.msk.bf16.mxu1 %vm3834_vm0, %v3832_v9 }
 0x849   : > { %v4485_v58 = vpop.f32.mrb[8].mxu0 }
 0x84a   : > { %v3156_v61 = vpop.f32.mrb[9].mxu0 }
 0x84b   : > { %v1562_v63 = vpop.f32.mrb[10].mxu0 }
 0x84c   : > { %v3157_v0 = vpop.f32.mrb[11].mxu0 }
 0x850   : > { %v4487_v1 = vpop.f32.mrb[24].mxu1 }
 0x851   : > { %v3162_v2 = vpop.f32.mrb[25].mxu1 }
 0x852   : > { %v1610_v3 = vpop.f32.mrb[26].mxu1 }
 0x853   : > { %v3163_v4 = vpop.f32.mrb[27].mxu1 }
 0x856   : > { %v1668_v5 = vpop.f32.mrb[12].mxu0 }
 0x857   : > { %v3168_v6 = vpop.f32.mrb[13].mxu0  ;;  %v1724_v7 = vsel %vm1273_vm3, %v1668_v5, -inf }
 0x858   : > { %1725 = vmax.xlane.f32.xlu0 %v1724_v7  ;;  %v1671_v8 = vpop.f32.mrb[14].mxu0  ;;  %v1718_v10 = vpop.f32.mrb[28].mxu1 }
 0x859   : > { %v3169_v11 = vpop.f32.mrb[15].mxu0  ;;  %v3174_v12 = vpop.f32.mrb[29].mxu1  ;;  %v1727_v13 = vsel %vm1273_vm3, %v1718_v10, -inf }
 0x85a   : > { %1728 = vmax.xlane.f32.xlu1 %v1727_v13  ;;  %v1721_v14 = vpop.f32.mrb[30].mxu1 }
 0x85b   : > { %v3175_v16 = vpop.f32.mrb[31].mxu1 }
 0x86b   : > { %1796 = vrot.lane.b32.xlu1 %v4428_v55, %s3836_s4 }
 0x86f   : > { %1857 = vrot.lane.b32.xlu1 %v4385_v15, %s3837_s6 }
 0x873   : > { %1907 = vrot.lane.b32.xlu1 %v4390_v19, %s3837_s6 }
 0x877   : > { %1905 = vrot.lane.b32.xlu1 %v4403_v26, %s3837_s6 }
 0x8e5   : > { %v1726_v17 = vpop.xlane.xlu0 %1725 }
 0x8e6   : > { %v1730_v18 = vsub.f32 %v1668_v5, %v1726_v17 }
 0x8e7   : > { %v1729_v21 = vpop.xlane.xlu1 %1728 }
 0x8e8   : > { %v1732_v22 = vmul.f32 1.442695, %v1730_v18  ;;  %v1731_v23 = vsub.f32 %v1718_v10, %v1729_v21 }
 0x8ea   : > { %3458 = vpow2.f32 %v1732_v22  ;;  %v1734_v24 = vmul.f32 1.442695, %v1731_v23 }
 0x8eb   : > { %v1797_v27 = vpop.permute.xlu1 %1796 }
 0x8ec   : > { %3460 = vpow2.f32 %v1734_v24  ;;  %v1802_v28 = vsel %vm1301_vm2, %v1797_v27, 0 }
 0x8ed   : > { %3183 = vmatpush3.bf16.msra.mxu1 %v1802_v28 }
 0x8ee   : > { %3194 = vmatprep.subr.bf16.mxu1 %v3832_v9 }
 0x8ef   : > { %v1858_v36 = vpop.permute.xlu1 %1857 }
 0x8f3   : > { %v1908_v41 = vpop.permute.xlu1 %1907 }
 0x8f4   : > { %v3459_v15 = vpop.eup %3458  ;;  %v1913_v43 = vsel %vm1180_vm1, %v1908_v41, 0 }
 0x8f5   : > { %v1736_v19 = vsel %vm1273_vm3, %v3459_v15, 0.0 }
 0x8f6   : > { %v3461_v29 = vpop.eup %3460  ;;  %1737 = vadd.xlane.f32.xlu0 %v1736_v19 }
 0x8f7   : > { %v1739_v26 = vsel %vm1273_vm3, %v3461_v29, 0.0  ;;  %v1906_v45 = vpop.permute.xlu1 %1905 }
 0x8fa   : > { %1740 = vadd.xlane.f32.xlu0 %v1739_v26 }
 0x910   : > { %1748 = vrot.lane.b32.xlu0 %v4401_v25, %s3836_s4 }
 0x914   : > { %1855 = vrot.lane.b32.xlu0 %v4392_v20, %s3837_s6  ;;  %v1863_v20 = vsel %vm1180_vm1, %v1858_v36, 0  ;;  %v3394_v36 = vld [vmem:[%s4311_s5 + $0x20] sm:$0xff]  }
 0x983   : > { %v1738_v30 = vpop.xlane.xlu0 %1737 }
 0x984   : > { %3462 = vrcp.f32 %v1738_v30 }
 0x987   : > { %v1741_v31 = vpop.xlane.xlu0 %1740 }
 0x988   : > { %3464 = vrcp.f32 %v1741_v31  ;;  %v3390_v31 = vld [vmem:[%s4311_s5] sm:$0xff]  }
 0x98b   : > { %v1749_v32 = vpop.permute.xlu0 %1748 }
 0x98c   : > { %v1754_v33 = vsel %vm1301_vm2, %v1749_v32, 0  ;;  %v3391_v32 = vld [vmem:[%s4311_s5 + $0x8] sm:$0xff]  }
 0x98d   : > { %3177 = vmatpush3.bf16.msra.mxu0 %v1754_v33  ;;  %v3392_v33 = vld [vmem:[%s4311_s5 + $0x10] sm:$0xff]  }
 0x98e   : > { %v3463_v34 = vpop.eup %3462  ;;  %3188 = vmatprep.subr.bf16.mxu0 %v3832_v9 }
 0x98f   : > { %v1744_v37 = vmul.f32 %v3463_v34, %v3459_v15  ;;  %v1856_v44 = vpop.permute.xlu0 %1855  ;;  %v3393_v34 = vld [vmem:[%s4311_s5 + $0x18] sm:$0xff]  }
 0x991   : > { %v1746_v38 = vpack.c.bf16 %v1744_v37, %v1744_v37  ;;  %v3396_v37 = vld [vmem:[%s4311_s5 + $0x30] sm:$0xff]  }
 0x992   : > { %v3465_v39 = vpop.eup %3464 }
 0x993   : > { %v1745_v40 = vmul.f32 %v3465_v39, %v3461_v29  ;;  %3179 = vmatmul.mubr.msk.bf16.vlgmr.msra.gmra.mrb[16].mxu0 %vm1273_vm3, %v1746_v38  ;;  %v3397_v38 = vld [vmem:[%s4311_s5 + $0x38] sm:$0xff]  }
 0x994   : > { %3190 = vmatprep.mubr.msk.bf16.mxu0 %vm3834_vm0, %v3832_v9 }
 0x995   : > { %v1747_v42 = vpack.c.bf16 %v1745_v40, %v1745_v40 }
 0x996   : > { %3189 = vmatpush3.bf16.xpose.msra.mxu0 %v1863_v20 }
 0x997   : > { %3185 = vmatmul.mubr.msk.bf16.vlgmr.msra.gmra.mrb[32].mxu1 %vm1273_vm3, %v1747_v42  ;;  %3200 = vmatprep.subr.bf16.mxu0 %v3832_v9 }
 0x998   : > { %3195 = vmatpush3.bf16.xpose.msra.mxu1 %v1913_v43  ;;  %3196 = vmatprep.mubr.msk.bf16.mxu1 %vm3834_vm0, %v3832_v9 }
 0x999   : > { %3206 = vmatprep.subr.bf16.mxu1 %v3832_v9 }
 0x99d   : > { %3191 = vmatmul.mubr.msk.bf16.vlgmr.msra.gmra.mrb[20].mxu0 %vm1180_vm1, %v1856_v44 }
 0x99e   : > { %3202 = vmatprep.mubr.msk.bf16.mxu0 %vm3834_vm0, %v3832_v9 }
 0x99f   : > { %3197 = vmatmul.mubr.msk.bf16.vlgmr.msra.gmra.mrb[36].mxu1 %vm1180_vm1, %v1906_v45 }
 0x9a0   : > { %3208 = vmatprep.mubr.msk.bf16.mxu1 %vm3834_vm0, %v3832_v9 }
 0xa66   : > { %v1790_v46 = vpop.f32.mrb[16].mxu0 }
 0xa67   : > { %v3180_v47 = vpop.f32.mrb[17].mxu0 }
 0xa68   : > { %v1793_v48 = vpop.f32.mrb[18].mxu0 }
 0xa69   : > { %v3181_v49 = vpop.f32.mrb[19].mxu0 }
 0xa6a   : > { %v1838_v50 = vpop.f32.mrb[32].mxu1 }
 0xa6b   : > { %v3186_v51 = vpop.f32.mrb[33].mxu1 }
 0xa6c   : > { %v1841_v52 = vpop.f32.mrb[34].mxu1 }
 0xa6d   : > { %v3187_v53 = vpop.f32.mrb[35].mxu1 }
 0xa70   : > { %v1899_v54 = vpop.f32.mrb[20].mxu0 }
 0xa71   : > { %v3192_v56 = vpop.f32.mrb[21].mxu0  ;;  %v1955_v57 = vsel %vm1273_vm3, %v1899_v54, -inf }
 0xa72   : > { %1956 = vmax.xlane.f32.xlu0 %v1955_v57  ;;  %v1902_v61 = vpop.f32.mrb[22].mxu0  ;;  %v1949_v63 = vpop.f32.mrb[36].mxu1  ;;  %v3486_v56 = vld [vmem:[#allocation2] sm:$0xff] }
 0xa73   : > { %v3193_v0 = vpop.f32.mrb[23].mxu0  ;;  %v3198_v2 = vpop.f32.mrb[37].mxu1  ;;  %v1958_v3 = vsel %vm1273_vm3, %v1949_v63, -inf }
 0xa74   : > { %1959 = vmax.xlane.f32.xlu1 %v1958_v3  ;;  %v1952_v4 = vpop.f32.mrb[38].mxu1  ;;  %v3487_v0 = vld [vmem:[#allocation2 + $0x8] sm:$0xff]  ;;  %v3398_v3 = vld [vmem:[%s4313_s14] ss:$8 sps:$4 sm:$0xff]  }
 0xa75   : > { %v3199_v5 = vpop.f32.mrb[39].mxu1  ;;  %v3400_v4 = vld [vmem:[%s4313_s14 + $0x4] ss:$8 sps:$4 sm:$0xff]  }
 0xa76   : > { %v3403_v5 = vld [vmem:[%s4313_s14 + $0x14] ss:$8 sps:$4 sm:$0xff]  }
 0xa85   : > { %2027 = vrot.lane.b32.xlu1 %v4428_v55, %s3837_s6 }
 0xa89   : > { %1615 = vrot.lane.b32.xlu1 %v4485_v58, %s3837_s6 }
 0xa8d   : > { %1617 = vrot.lane.b32.xlu1 %v4487_v1, %s3837_s6 }
 0xa91   : > { %1848 = vrot.lane.b32.xlu1 %v1838_v50, %s3836_s4  ;;  %v2964_v50 = vld [vmem:[%s828_s15] ss:$0 sm:$0xff] }
 0xaff   : > { %v1957_v6 = vpop.xlane.xlu0 %1956 }
 0xb00   : > { %v1961_v7 = vsub.f32 %v1899_v54, %v1957_v6  ;;  %v3401_v6 = vld [vmem:[%s4313_s14 + $0x10] ss:$8 sps:$4 sm:$0xff]  }
 0xb01   : > { %v1960_v8 = vpop.xlane.xlu1 %1959 }
 0xb02   : > { %v1963_v10 = vmul.f32 1.442695, %v1961_v7  ;;  %v1962_v11 = vsub.f32 %v1949_v63, %v1960_v8 }
 0xb04   : > { %3466 = vpow2.f32 %v1963_v10  ;;  %v1965_v12 = vmul.f32 1.442695, %v1962_v11 }
 0xb05   : > { %v2028_v13 = vpop.permute.xlu1 %2027 }
 0xb06   : > { %3468 = vpow2.f32 %v1965_v12  ;;  %v2033_v14 = vsel %vm1301_vm2, %v2028_v13, 0 }
 0xb07   : > { %3207 = vmatpush3.bf16.msra.mxu1 %v2033_v14 }
 0xb08   : > { %2352 = vmatprep.subr.bf16.mxu1 %v3400_v4 }
 0xb09   : > { %v1616_v55 = vpop.permute.xlu1 %1615 }
 0xb0a   : > { %1622 = vst.msk [vmem:[#allocation3] sm:$0xff] %vm1621_vm4, %v1616_v55 }
 0xb0d   : > { %v1618_v58 = vpop.permute.xlu1 %1617 }
 0xb0e   : > { %v3467_v16 = vpop.eup %3466  ;;  %1623 = vst.msk [vmem:[#allocation3 + $0x8] sm:$0xff] %vm1621_vm4, %v1618_v58  ;;  %v3406_v58 = vld [vmem:[%s4313_s14 + $0x24] ss:$8 sps:$4 sm:$0xff]  }
 0xb0f   : > { %v1967_v1 = vsel %vm1273_vm3, %v3467_v16, 0.0 }
 0xb10   : > { %v3469_v17 = vpop.eup %3468  ;;  %1968 = vadd.xlane.f32.xlu0 %v1967_v1  ;;  %v3409_v1 = vld [vmem:[%s4313_s14 + $0x34] ss:$8 sps:$4 sm:$0xff]  }
 0xb11   : > { %v1849_v18 = vpop.permute.xlu1 %1848  ;;  %v1970_v21 = vsel %vm1273_vm3, %v3469_v17, 0.0 }
 0xb12   : > { %1854 = vst.msk [vmem:[#allocation3 + $0x8] sm:$0xff] %vm1852_vm5, %v1849_v18  ;;  %v3412_v18 = vld [vmem:[%s4313_s14 + $0x44] ss:$8 sps:$4 sm:$0xff]  }
 0xb14   : > { %1971 = vadd.xlane.f32.xlu0 %v1970_v21  ;;  %v3410_v21 = vld [vmem:[%s4313_s14 + $0x40] ss:$8 sps:$4 sm:$0xff]  }
 0xb2a   : > { %1979 = vrot.lane.b32.xlu0 %v4401_v25, %s3837_s6 }
 0xb2e   : > { %1846 = vrot.lane.b32.xlu0 %v1790_v46, %s3836_s4 }
 0xb9d   : > { %v1969_v22 = vpop.xlane.xlu0 %1968 }
 0xb9e   : > { %3470 = vrcp.f32 %v1969_v22  ;;  %v3415_v22 = vld [vmem:[%s4313_s14 + $0x54] ss:$8 sps:$4 sm:$0xff]  }
 0xba1   : > { %v1972_v23 = vpop.xlane.xlu0 %1971 }
 0xba2   : > { %3472 = vrcp.f32 %v1972_v23  ;;  %v3413_v23 = vld [vmem:[%s4313_s14 + $0x50] ss:$8 sps:$4 sm:$0xff]  }
 0xba5   : > { %v1980_v24 = vpop.permute.xlu0 %1979 }
 0xba6   : > { %v1985_v27 = vsel %vm1301_vm2, %v1980_v24, 0  ;;  %v3418_v24 = vld [vmem:[%s4313_s14 + $0x64] ss:$8 sps:$4 sm:$0xff]  }
 0xba7   : > { %3201 = vmatpush3.bf16.msra.mxu0 %v1985_v27  ;;  %v3416_v27 = vld [vmem:[%s4313_s14 + $0x60] ss:$8 sps:$4 sm:$0xff]  }
 0xba8   : > { %v3471_v28 = vpop.eup %3470  ;;  %3212 = vmatprep.subr.bf16.mxu0 %v3832_v9 }
 0xba9   : > { %v1975_v15 = vmul.f32 %v3471_v28, %v3467_v16  ;;  %v1847_v19 = vpop.permute.xlu0 %1846  ;;  %v3404_v16 = vld [vmem:[%s4313_s14 + $0x20] ss:$8 sps:$4 sm:$0xff]   ;;  %v3421_v28 = vld [vmem:[%s4313_s14 + $0x74] ss:$8 sps:$4 sm:$0xff]  }
 0xbaa   : > { %1853 = vst.msk [vmem:[#allocation3] sm:$0xff] %vm1852_vm5, %v1847_v19  ;;  %v3422_v19 = vld [vmem:[%s4315_s9 + $0x40] sm:$0xff]  }
 0xbab   : > { %v1977_v25 = vpack.c.bf16 %v1975_v15, %v1975_v15  ;;  %v3419_v15 = vld [vmem:[%s4313_s14 + $0x70] ss:$8 sps:$4 sm:$0xff]  }
 0xbac   : > { %v3473_v29 = vpop.eup %3472 }
 0xbad   : > { %v1976_v26 = vmul.f32 %v3473_v29, %v3469_v17  ;;  %3203 = vmatmul.mubr.msk.bf16.vlgmr.msra.gmra.mrb[24].mxu0 %vm1273_vm3, %v1977_v25  ;;  %v3407_v17 = vld [vmem:[%s4313_s14 + $0x30] ss:$8 sps:$4 sm:$0xff]   ;;  %v3423_v25 = vld [vmem:[%s4315_s9] sm:$0xff]   ;;  %v3424_v29 = vld [vmem:[%s4315_s9 + $0x48] sm:$0xff]  }
 0xbae   : > { %3228 = vmatprep.mubr.msk.bf16.mxu0 %vm3834_vm0, %v3832_v9  ;;  %3213 = vmatpush3.bf16.msra.mxu0 %v3390_v31 }
 0xbaf   : > { %v1978_v30 = vpack.c.bf16 %v1976_v26, %v1976_v26  ;;  %3214 = vmatprep.subr.bf16.mxu0 %v3832_v9  ;;  %v3425_v26 = vld [vmem:[%s4315_s9 + $0x8] sm:$0xff]  }
 0xbb1   : > { %3209 = vmatmul.mubr.msk.bf16.vlgmr.msra.gmra.mrb[40].mxu1 %vm1273_vm3, %v1978_v30 }
 0xbb2   : > { %2384 = vmatprep.mubr.bf16.mxu1 %v3833_v35  ;;  %3215 = vmatpush3.bf16.msra.mxu0 %v3391_v32  ;;  %v3395_v35 = vld [vmem:[%s4311_s5 + $0x28] sm:$0xff]  }
 0xbb3   : > { %3216 = vmatprep.subr.bf16.mxu0 %v3832_v9  ;;  %2353 = vmatpush1.bf16.msra.mxu1 %v3398_v3 }
 0xbb4   : > { %2354 = vmatprep.subr.bf16.mxu1 %v3403_v5 }
 0xbb6   : > { %3217 = vmatpush3.bf16.msra.mxu0 %v3392_v33 }
 0xbb7   : > { %3218 = vmatprep.subr.bf16.mxu0 %v3832_v9  ;;  %2355 = vmatpush1.bf16.msra.mxu1 %v3401_v6 }
 0xbb8   : > { %2356 = vmatprep.subr.bf16.mxu1 %v3406_v58 }
 0xbba   : > { %3219 = vmatpush3.bf16.msra.mxu0 %v3393_v34 }
 0xbbb   : > { %3220 = vmatprep.subr.bf16.mxu0 %v3832_v9  ;;  %2357 = vmatpush1.bf16.msra.mxu1 %v3404_v16 }
 0xbbc   : > { %2358 = vmatprep.subr.bf16.mxu1 %v3409_v1 }
 0xbbe   : > { %3221 = vmatpush3.bf16.msra.mxu0 %v3394_v36 }
 0xbbf   : > { %3222 = vmatprep.subr.bf16.mxu0 %v3832_v9  ;;  %2359 = vmatpush1.bf16.msra.mxu1 %v3407_v17 }
 0xbc0   : > { %2360 = vmatprep.subr.bf16.mxu1 %v3412_v18 }
 0xbc2   : > { %3223 = vmatpush3.bf16.msra.mxu0 %v3395_v35 }
 0xbc3   : > { %3224 = vmatprep.subr.bf16.mxu0 %v3832_v9  ;;  %2361 = vmatpush1.bf16.msra.mxu1 %v3410_v21 }
 0xbc4   : > { %2362 = vmatprep.subr.bf16.mxu1 %v3415_v22 }
 0xbc6   : > { %3225 = vmatpush3.bf16.msra.mxu0 %v3396_v37 }
 0xbc7   : > { %3226 = vmatprep.subr.bf16.mxu0 %v3832_v9  ;;  %2363 = vmatpush1.bf16.msra.mxu1 %v3413_v23 }
 0xbc8   : > { %2364 = vmatprep.subr.bf16.mxu1 %v3418_v24 }
 0xbca   : > { %3227 = vmatpush3.bf16.msra.mxu0 %v3397_v38  ;;  %v2973_v38 = vld [vmem:[%s831_s2] ss:$0 sm:$0xff] }
 0xbcb   : > { %2365 = vmatpush1.bf16.msra.mxu1 %v3416_v27  ;;  %3074 = vmatprep.subr.bf16.mxu0 %v3422_v19 }
 0xbcc   : > { %2366 = vmatprep.subr.bf16.mxu1 %v3421_v28 }
 0xbcf   : > { %2367 = vmatpush1.bf16.msra.mxu1 %v3419_v15 }
 0xc80   : > { %v2021_v39 = vpop.f32.mrb[24].mxu0 }
 0xc81   : > { %2077 = vrot.lane.b32.xlu0 %v2021_v39, %s3835_s3  ;;  %v3204_v40 = vpop.f32.mrb[25].mxu0 }
 0xc82   : > { %v2024_v41 = vpop.f32.mrb[26].mxu0 }
 0xc83   : > { %v3205_v20 = vpop.f32.mrb[27].mxu0 }
 0xc84   : > { %v2069_v42 = vpop.f32.mrb[40].mxu1  ;;  %v2974_v20 = vld [vmem:[%s834_s19] ss:$0 sm:$0xff] }
 0xc85   : > { %2079 = vrot.lane.b32.xlu1 %v2069_v42, %s3835_s3  ;;  %v3210_v43 = vpop.f32.mrb[41].mxu1 }
 0xc86   : > { %v2072_v44 = vpop.f32.mrb[42].mxu1 }
 0xc87   : > { %v3211_v45 = vpop.f32.mrb[43].mxu1 }
 0xcf3   : > { %v2078_v46 = vpop.permute.xlu0 %2077 }
 0xcf4   : > { %2084 = vst.msk [vmem:[#allocation3] sm:$0xff] %vm2083_vm6, %v2078_v46  ;;  %v3426_v46 = vld [vmem:[%s4315_s9 + $0x50] sm:$0xff]  }
 0xcf7   : > { %v2080_v47 = vpop.permute.xlu1 %2079 }
 0xcf8   : > { %2085 = vst.msk [vmem:[#allocation3 + $0x8] sm:$0xff] %vm2083_vm6, %v2080_v47  ;;  %v3427_v47 = vld [vmem:[%s4315_s9 + $0x10] sm:$0xff]  }
 0xcfb   : > { %v2086_v9 = vld [vmem:[#allocation3] sm:$0xff] }
 0xcff   : > { %v2087_v48 = vld [vmem:[#allocation3 + $0x8] sm:$0xff] }
 0xd00   : > { %v2088_v49 = vpack.c.bf16 %v2087_v48, %v2086_v9  ;;  %v3428_v9 = vld [vmem:[%s4315_s9 + $0x58] sm:$0xff]  }
 0xd01   : > { %v3429_v48 = vld [vmem:[%s4315_s9 + $0x18] sm:$0xff]  }
 0xd02   : > { %3229 = vmatmul.mubr.bf16.vlgmr.msra.gmra.mrb[28].mxu0 %v2088_v49  ;;  %v3430_v49 = vld [vmem:[%s4315_s9 + $0x60] sm:$0xff]  }
 0xd03   : > { %3075 = vmatpush3.bf16.msra.mxu0 %v3423_v25 }
 0xd04   : > { %3076 = vmatprep.subr.bf16.mxu0 %v3424_v29 }
 0xd07   : > { %3077 = vmatpush3.bf16.msra.mxu0 %v3425_v26 }
 0xd08   : > { %3078 = vmatprep.subr.bf16.mxu0 %v3426_v46 }
 0xd0b   : > { %3079 = vmatpush3.bf16.msra.mxu0 %v3427_v47 }
 0xd0c   : > { %3080 = vmatprep.subr.bf16.mxu0 %v3428_v9 }
 0xd0f   : > { %3081 = vmatpush3.bf16.msra.mxu0 %v3429_v48 }
 0xd10   : > { %3082 = vmatprep.subr.bf16.mxu0 %v3430_v49 }
 0xdd5   : > { %v2194_v51 = vpop.f32.mrb[28].mxu0 }
 0xdd6   : > { %v2195_v52 = vadd.f32 %v2964_v50, %v2194_v51  ;;  %v3230_v53 = vpop.f32.mrb[29].mxu0  ;;  %v3432_v51 = vld [vmem:[%s4315_s9 + $0x68] sm:$0xff]  }
 0xdd7   : > { %v2197_v54 = vpop.f32.mrb[30].mxu0  ;;  %v3434_v53 = vld [vmem:[%s4315_s9 + $0x70] sm:$0xff]  }
 0xdd8   : > { %v4571_v57 = vadd.f32 %v3486_v56, %v2195_v52  ;;  %v2198_v61 = vadd.f32 %v2964_v50, %v2197_v54  ;;  %v3231_v63 = vpop.f32.mrb[31].mxu0  ;;  %v3431_v50 = vld [vmem:[%s4315_s9 + $0x20] sm:$0xff]   ;;  %v3433_v52 = vld [vmem:[%s4315_s9 + $0x28] sm:$0xff]   ;;  %v3435_v54 = vld [vmem:[%s4315_s9 + $0x30] sm:$0xff]  }
 0xdd9   : > { %3083 = vmatpush3.bf16.msra.mxu0 %v3431_v50  ;;  %v3436_v56 = vld [vmem:[%s4315_s9 + $0x78] sm:$0xff]   ;;  %v2260_v63 = vld [vmem:[%s4302_s25] sm:$0x3] }
 0xdda   : > { %v4573_v2 = vadd.f32 %v3487_v0, %v2198_v61  ;;  %2205 = vadd.xlane.f32.xlu0 %v4571_v57  ;;  %3084 = vmatprep.subr.bf16.mxu0 %v3432_v51  ;;  %v3437_v61 = vld [vmem:[%s4315_s9 + $0x38] sm:$0xff]   ;;  %v2265_v0 = vrot.slane %v2260_v63, %v935_v62  ;;  %v2269_v3 = vrot.slane %v2260_v63, %v939_v60 }
 0xddc   : > { %2207 = vadd.xlane.f32.xlu1 %v4573_v2 }
 0xddd   : > { %3085 = vmatpush3.bf16.msra.mxu0 %v3433_v52  ;;  %v3009_v52 = vld [vmem:[%s4784_s30] ss:$0 sm:$0xff] (!%p3008_p12) }
 0xdde   : > { %3086 = vmatprep.subr.bf16.mxu0 %v3434_v53 }
 0xde1   : > { %3087 = vmatpush3.bf16.msra.mxu0 %v3435_v54  ;;  %v3010_v54 = vld [vmem:[%s4785_s16] ss:$0 sm:$0xff] (!%p3008_p12) }
 0xde2   : > { %3088 = vmatprep.subr.bf16.mxu0 %v3436_v56 }
 0xde5   : > { %3089 = vmatpush3.bf16.msra.mxu0 %v3437_v61 }
 0xe67   : > { %v2206_v7 = vpop.xlane.xlu0 %2205 }
 0xe68   : > { %v2209_v8 = vmul.f32 0.0078125, %v2206_v7 }
 0xe69   : > { %v2208_v10 = vpop.xlane.xlu1 %2207 }
 0xe6a   : > { %v2211_v11 = vsub.f32 %v4571_v57, %v2209_v8  ;;  %v2210_v12 = vmul.f32 0.0078125, %v2208_v10 }
 0xe6c   : > { %v2212_v13 = vsub.f32 %v4573_v2, %v2210_v12  ;;  %v2213_v14 = vmul.f32 %v2211_v11, %v2211_v11 }
 0xe6e   : > { %2215 = vadd.xlane.f32.xlu0 %v2213_v14  ;;  %v2214_v55 = vmul.f32 %v2212_v13, %v2212_v13 }
 0xe72   : > { %2217 = vadd.xlane.f32.xlu0 %v2214_v55 }
 0xefb   : > { %v2216_v30 = vpop.xlane.xlu0 %2215 }
 0xefc   : > { %v2219_v31 = vmul.f32 0.0078125, %v2216_v30 }
 0xefe   : > { %v2221_v32 = vadd.f32 1e-05, %v2219_v31  ;;  %v2991_v31 = vld [vmem:[%s841_s7] ss:$0 sm:$0xff] }
 0xeff   : > { %v2218_v33 = vpop.xlane.xlu0 %2217 }
 0xf00   : > { %3474 = vrsqrt.f32 %v2221_v32  ;;  %v2220_v34 = vmul.f32 0.0078125, %v2218_v33 }
 0xf02   : > { %v2222_v36 = vadd.f32 1e-05, %v2220_v34 }
 0xf04   : > { %3476 = vrsqrt.f32 %v2222_v36 }
 0xf0a   : > { %v3475_v35 = vpop.eup %3474 }
 0xf0b   : > { %v2225_v37 = vmul.f32 %v3475_v35, %v2211_v11 }
 0xf0d   : > { %v2233_v41 = vmul.f32 %v2973_v38, %v2225_v37 }
 0xf0e   : > { %v3477_v39 = vpop.eup %3476 }
 0xf0f   : > { %v2226_v40 = vmul.f32 %v3477_v39, %v2212_v13  ;;  %v2241_v43 = vadd.f32 %v2974_v20, %v2233_v41 }
 0xf11   : > { %v2234_v42 = vmul.f32 %v2973_v38, %v2226_v40 }
 0xf13   : > { %v2242_v44 = vadd.f32 %v2974_v20, %v2234_v42 }
 0xf15   : > { %v2243_v45 = vpack.c.bf16 %v2242_v44, %v2241_v43 }
 0xf17   : > { %2385 = vmatmul.mubr.bf16.vlgmr.msra.gmra.mrb[44].mxu1 %v2243_v45 }
 0xfea   : > { %v2386_v4 = vpop.f32.mrb[44].mxu1 }
 0xfeb   : > { %v2387_v5 = vadd.f32 %v2386_v4, %v2265_v0  ;;  %v2388_v6 = vpop.f32.mrb[45].mxu1 }
 0xfec   : > { %v2389_v7 = vadd.f32 %v2388_v6, %v2269_v3  ;;  %v2390_v8 = vpop.f32.mrb[46].mxu1 }
 0xfed   : > { %v2399_v10 = vmul.f32 0.70710677, %v2387_v5  ;;  %v2391_v11 = vadd.f32 %v2390_v8, %v2265_v0  ;;  %v2392_v12 = vpop.f32.mrb[47].mxu1  ;;  %v2395_v18 = vmul.f32 0.5, %v2387_v5 }
 0xfee   : > { %v2400_v13 = vmul.f32 0.70710677, %v2389_v7  ;;  %v2393_v14 = vadd.f32 %v2392_v12, %v2269_v3  ;;  %v2396_v23 = vmul.f32 0.5, %v2389_v7 }
 0xfef   : > { %3478 = verf.f32 %v2399_v10  ;;  %v2401_v55 = vmul.f32 0.70710677, %v2391_v11  ;;  %v2397_v21 = vmul.f32 0.5, %v2391_v11 }
 0xff0   : > { %3480 = verf.f32 %v2400_v13  ;;  %v2402_v58 = vmul.f32 0.70710677, %v2393_v14  ;;  %v2398_v24 = vmul.f32 0.5, %v2393_v14 }
 0xff1   : > { %3482 = verf.f32 %v2401_v55 }
 0xff2   : > { %3484 = verf.f32 %v2402_v58 }
 0xff9   : > { %v3479_v62 = vpop.eup %3478 }
 0xffa   : > { %v3481_v16 = vpop.eup %3480  ;;  %v2407_v59 = vadd.f32 1.0, %v3479_v62 }
 0xffb   : > { %v3483_v60 = vpop.eup %3482  ;;  %v2408_v1 = vadd.f32 1.0, %v3481_v16 }
 0xffc   : > { %v3485_v17 = vpop.eup %3484  ;;  %v2409_v22 = vadd.f32 1.0, %v3483_v60  ;;  %v2411_v28 = vmul.f32 %v2407_v59, %v2395_v18 }
 0xffd   : > { %v2410_v27 = vadd.f32 1.0, %v3485_v17  ;;  %v2412_v19 = vmul.f32 %v2408_v1, %v2396_v23 }
 0xffe   : > { %v2413_v15 = vmul.f32 %v2409_v22, %v2397_v21 }
 0xfff   : > { %v2414_v25 = vmul.f32 %v2410_v27, %v2398_v24 }
0x1000   : > { %v2415_v29 = vpack.c.bf16 %v2413_v15, %v2411_v28 }
0x1001   : > { %v2416_v26 = vpack.c.bf16 %v2414_v25, %v2412_v19 }
0x1003   : > { %2584 = vmatprep.mubr.bf16.mxu0 %v2416_v26 }
0x1004   : > { %2585 = vmatmul.mubr.bf16.vlgmr.msra.gmra.mrb[32].mxu0 %v2415_v29 }
0x10d7   : > { %v3090_v30 = vpop.f32.mrb[32].mxu0 }
0x10d8   : > { %v3091_v32 = vpop.f32.mrb[33].mxu0 }
0x10d9   : > { %v3092_v33 = vadd.f32 %v3091_v32, %v3090_v30  ;;  %v3093_v34 = vpop.f32.mrb[34].mxu0 }
0x10da   : > { %v3094_v36 = vpop.f32.mrb[35].mxu0 }
0x10db   : > { %v2587_v35 = vadd.f32 %v3092_v33, %v2991_v31  ;;  %v3095_v37 = vadd.f32 %v3094_v36, %v3093_v34  ;;  %2600 = sbr.rel (%p3008_p12) target bundleno = 4635 (0x121b), region = 124 }
0x10dd   : > { %v2593_v38 = vadd.f32 %v2587_v35, %v4571_v57  ;;  %v2590_v39 = vadd.f32 %v3095_v37, %v2991_v31 }
0x10df   : > { %2595 = vst [vmem:[#allocation2] sm:$0xff] %v2593_v38  ;;  %v2594_v40 = vadd.f32 %v2590_v39, %v4573_v2  ;;  %2603 = vadd.xlane.f32.xlu0 (!%p3008_p12), %v2593_v38 }
0x10e1   : > { %2596 = vst [vmem:[#allocation2 + $0x8] sm:$0xff] %v2594_v40 }
0x10e3   : > { %2605 = vadd.xlane.f32.xlu0 %v2594_v40 }
0x116c   : > { %v2604_v41 = vpop.xlane.xlu0 %2603 }
0x116d   : > { %v2607_v20 = vmul.f32 0.0078125, %v2604_v41 }
0x116f   : > { %v2609_v42 = vsub.f32 %v2593_v38, %v2607_v20 }
0x1170   : > { %v2606_v43 = vpop.xlane.xlu0 %2605 }
0x1171   : > { %v2608_v44 = vmul.f32 0.0078125, %v2606_v43  ;;  %v2611_v45 = vmul.f32 %v2609_v42, %v2609_v42 }
0x1173   : > { %v2610_v46 = vsub.f32 %v2594_v40, %v2608_v44  ;;  %2613 = vadd.xlane.f32.xlu1 %v2611_v45 }
0x1175   : > { %v2612_v47 = vmul.f32 %v2610_v46, %v2610_v46 }
0x1177   : > { %2615 = vadd.xlane.f32.xlu1 %v2612_v47 }
0x1200   : > { %v2614_v57 = vpop.xlane.xlu1 %2613 }
0x1201   : > { %v2617_v9 = vmul.f32 0.0078125, %v2614_v57 }
0x1203   : > { %v2619_v48 = vadd.f32 1e-05, %v2617_v9 }
0x1204   : > { %v2616_v2 = vpop.xlane.xlu1 %2615 }
0x1205   : > { %3488 = vrsqrt.f32 %v2619_v48  ;;  %v2618_v49 = vmul.f32 0.0078125, %v2616_v2 }
0x1207   : > { %v2620_v50 = vadd.f32 1e-05, %v2618_v49 }
0x1209   : > { %3490 = vrsqrt.f32 %v2620_v50 }
0x120f   : > { %v3489_v51 = vpop.eup %3488 }
0x1210   : > { %v2623_v53 = vmul.f32 %v3489_v51, %v2609_v42 }
0x1212   : > { %v2631_v56 = vmul.f32 %v3009_v52, %v2623_v53 }
0x1213   : > { %v3491_v61 = vpop.eup %3490 }
0x1214   : > { %v2639_v63 = vadd.f32 %v3010_v54, %v2631_v56  ;;  %v2624_v0 = vmul.f32 %v3491_v61, %v2610_v46 }
0x1216   : > { %2641 = vst [vmem:[#allocation15] sm:$0xff] %v2639_v63  ;;  %v2632_v3 = vmul.f32 %v3009_v52, %v2624_v0 }
0x1218   : > { %v2640_v4 = vadd.f32 %v3010_v54, %v2632_v3 }
0x121a   : > { %2642 = vst [vmem:[#allocation15 + $0x8] sm:$0xff] %v2640_v4 }
0x121b PF: > { %p3291_p0 = scmp.eq.s32.totalorder %s3955_s27, 1  ;;  %s3838_s7 = smov [#allocation15]  }
0x121c   : > { %s2652_s28 = sshll.u32 %s3838_s7, 4  ;;  %s2653_s28 = int_to_ptr.vmem [resolvable:$true] %s2652_s28 }
0x121d   : > { %s3728_s8 = scalar_lea.vmem %s2653_s28, 256  ;;  %p3735_p2 = scmp.lt.s32.totalorder %s2653_s28, %s2653_s28 }
0x121e   : > { %p3729_p13 = scmp.ne.s32.totalorder %s2653_s28, %s3728_s8  ;;  %p3736_p9 = scmp.lt.s32.totalorder %s3728_s8, %s3728_s8 }
0x1220   : > { %p3730_p3 = pnand %p3729_p13, %p3291_p0  ;;  %p3737_p10 = por %p3736_p9, %p3735_p2 }
0x1222   : > { %p3731_p6 = pneg %p3730_p3 }
0x1224   : > { %p3738_p8 = pnand %p3737_p10, %p3731_p6 }
0x1226   : > { %3741 = shalt.err (!%p3738_p8)
}
0x1227   : > { %s4786_s9 = sld [smem:[#allocation40_spill]] }
0x122d   : > { %s3742_s1 = scalar_lea.hbm %s4786_s9, 256 }
0x122e   : > { %p3743_p4 = scmp.ne.s32.totalorder %s4786_s9, %s3742_s1  ;;  %p3748_p11 = scmp.lt.u32.totalorder %s3742_s1, %s4786_s9 }
0x1230   : > { %p3744_p5 = pnand %p3743_p4, %p3291_p0 }
0x1232   : > { %p3745_p1 = pneg %p3744_p5 }
0x1234   : > { %p3750_p7 = pnand %p3748_p11, %p3745_p1 }
0x1236   : > { %3753 = shalt.err (!%p3750_p7)
}
0x1237   : > { %s3839_s12 = smov 128   ;;  %s3840_s20 = smov 8  }
0x1238   : > { %3257 = dma.vmem_to_hbm [thread:$0]  (%p3291_p0), %s2653_s28, 256, %s4786_s9, [#allocation6], %s3839_s12, %s3839_s12, %s3840_s20  }
0x1239   : > { %3791 = dma.done.wait (%p3291_p0), [#allocation6], 256  }
0x123a   : > { %3793 = vsyncadd (%p3291_p0), [#allocation6], 4294967040 }
0x123b PF: > { %s29_s26 = sadd.s32 1, %s3816_s26   ;;  %s4787_s18 = sld [smem:[#allocation20_spill]] }
0x123c   : > { %p26_p12 = scmp.ge.s32.totalorder %s29_s26, 4   ;;  %s4788_s23 = sld [smem:[#allocation23_spill]] }
0x123d   : > { %s4789_s24 = sld [smem:[#allocation21_spill]]  ;;  %s4790_s25 = sld [smem:[#allocation22_spill]] }
0x123e   : > { %s4791_s21 = smov %s3800_s22  ;;  %28 = sbr.rel (!%p26_p12) target bundleno = 23 (0x17), region = 211 }
0x1241   : > { %s4792_s22 = smov %s4787_s18 }
0x1245   :  { %2668 = vsyncpa [#allocation5], 1 }
0x1246   :  { %2670 = vsyncpa [#allocation5 + $0x1], 1 }
0x1247   :  { %2671 = vsyncpa [#allocation8], 1 }
0x1248   :  { %2672 = vsyncpa [#allocation6], 1 }
0x1249   :  { %2674 = vsyncpa [#allocation6 + $0x1], 1 }

</bundles_post_ra>
